<compile_context>
chip_gen: v7x
topology: tpu7x:2x2x1
jax: 0.10.0
libtpu: 0.0.40
codegen_flags: <defaults>
</compile_context>

<pallas_src>
import functools

import jax
import jax.numpy as jnp
from jax import lax
from jax.experimental import pallas as pl
from jax.experimental.pallas import tpu as pltpu


# ----------------------------- Pallas kernels ---------------------------------- #

def node_embed_kernel(x_ref, adj_ref,
                      w1_ref, al1_ref, ar1_ref, b1_ref,
                      w2_ref, al2_ref, ar2_ref, b2_ref,
                      wsrc_ref, wdst_ref,
                      hs_ref, hd_ref):
    """conv1 -> relu -> conv2 -> relu, then pre-project h @ W_src and h @ W_dst."""
    adj = adj_ref[...].astype(jnp.float32)     # bf16 multiplicities, widened once
    mask = adj > 0.0
    contract_last = (((1,), (1,)), ((), ()))   # contract feature dim of both operands

    def supergat_relu(x, w, att_l, att_r, bias):
        n = x.shape[0]
        xp = jnp.dot(x, w, preferred_element_type=jnp.float32)            # (N, F) f32
        xp_bf = xp.astype(jnp.bfloat16)
        # Fused logits + att_l row score: one (N+1,F) x (N,F)^T bf16 MXU matmul.
        lhs = jnp.concatenate([xp, att_l], axis=0).astype(jnp.bfloat16)   # (N+1, F)
        scores = lax.dot_general(lhs, xp_bf, contract_last,
                                 preferred_element_type=jnp.float32)      # (N+1, N)
        logits = scores[:n, :]                                            # x'_i . x'_j
        s_src = scores[n:n + 1, :]                                        # (1, N)
        s_dst = jnp.sum(xp * att_r, axis=-1, keepdims=True)               # (N, 1)
        e = (s_dst + s_src) * jax.nn.sigmoid(logits)                      # (N, N)
        e = jnp.maximum(e, 0.2 * e)                                       # leaky_relu(0.2)
        e = jnp.where(mask, e, -jnp.inf)
        m = jnp.max(e, axis=1, keepdims=True)                             # diag present
        p = jnp.exp(e - m) * adj               # duplicate edges weighted by multiplicity
        denom = jnp.sum(p, axis=1, keepdims=True)
        alpha = p * pl.reciprocal(denom, approx=True)                     # EUP vrcp
        out = jnp.dot(alpha.astype(jnp.bfloat16), xp_bf,
                      preferred_element_type=jnp.float32) + bias
        return jnp.maximum(out, 0.0)                                      # .relu()

    h = supergat_relu(x_ref[...], w1_ref[...], al1_ref[...], ar1_ref[...], b1_ref[...])
    h = supergat_relu(h, w2_ref[...], al2_ref[...], ar2_ref[...], b2_ref[...])
    # Pre-project so the edge kernel only needs a gather (small f32 matmuls).
    hs_ref[...] = jnp.dot(h, wsrc_ref[...], preferred_element_type=jnp.float32)
    hd_ref[...] = jnp.dot(h, wdst_ref[...], preferred_element_type=jnp.float32)


def edge_mlp_kernel(src_ref, dst_ref, ea_ref, hs_ref, hd_ref,
                    wedge_ref, b1_ref, w2_ref, b2_ref, out_ref, *, n_edges):
    """relu(h[src]@W_src + edge_attr@W_edge + h[dst]@W_dst + b1) @ w2 + b2, one edge tile."""
    te = src_ref.shape[0]
    n = hs_ref.shape[0]
    # One-hot gather matrices built in-register from int32 endpoint indices
    # (no (E_pad, N) HBM traffic); 0/1 values are exact in bf16.
    col = lax.broadcasted_iota(jnp.int32, (te, n), 1)
    src_oh = (col == src_ref[...]).astype(jnp.bfloat16)                   # (TE, N)
    dst_oh = (col == dst_ref[...]).astype(jnp.bfloat16)                   # (TE, N)
    g_src = jnp.dot(src_oh, hs_ref[...].astype(jnp.bfloat16),
                    preferred_element_type=jnp.float32)                   # (TE, H)
    g_dst = jnp.dot(dst_oh, hd_ref[...].astype(jnp.bfloat16),
                    preferred_element_type=jnp.float32)                   # (TE, H)
    he = jnp.dot(ea_ref[...], wedge_ref[...],
                 preferred_element_type=jnp.float32)                      # (TE, H)
    hidden = jnp.maximum(g_src + he + g_dst + b1_ref[...], 0.0)           # (TE, H)
    # Final Linear(H, 1) emitted as a lane-dense (1, TE) row.
    logit = lax.dot_general(w2_ref[...], hidden, (((1,), (1,)), ((), ())),
                            preferred_element_type=jnp.float32) + b2_ref[...]
    # Zero padded edge columns so partial-tile garbage never leaves the kernel.
    gcol = pl.program_id(0) * te + lax.broadcasted_iota(jnp.int32, (1, te), 1)
    out_ref[...] = jnp.where(gcol < n_edges, logit, 0.0)


# --------------------------------- wrappers ------------------------------------ #

def _vmem_cap_bytes():
    """~80% of physical VMEM (v5e/v6e: ~102 MiB, v7x: ~51 MiB); safe fallback 48 MiB."""
    try:
        info = pltpu.get_tpu_info()
        cap = int(getattr(info, "vmem_capacity_bytes") * 0.8)
    except Exception:
        cap = 48 * (1 << 20)
    return max(cap, 16 << 20)


def build_adjacency(edge_index, num_nodes):
    """Dense (N_dst, N_src) edge-multiplicity matrix with existing self-loops removed
    and one self-loop added per node (matches SuperGATConv add_self_loops)."""
    src, dst = edge_index[0], edge_index[1]
    keep = (src != dst).astype(jnp.float32)
    adj = jnp.zeros((num_nodes, num_nodes), jnp.float32)
    adj = adj.at[dst, src].add(keep)
    adj = adj + jnp.eye(num_nodes, dtype=jnp.float32)
    return adj          # small-integer multiplicities: exact in bf16


def edge_prediction_gnn_forward(params, x, edge_index, edge_attr):
    N = x.shape[0]
    E = edge_index.shape[1]
    H = params["w2"].shape[1]            # hidden_channels
    edge_dim = edge_attr.shape[1]
    f_max = max(x.shape[1], params["w1"].shape[1], H)

    # TODO(synk): hoist this graph preprocessing (scatter-add adjacency, index padding)
    # out of the per-forward path when the graph is static across steps.
    adj = build_adjacency(edge_index, N).astype(jnp.bfloat16)

    # Split mlp.W1 ([src | edge_attr | dst] concat order) and row-ify mlp.W2.
    mw1 = params["mw1"]
    mw_src = mw1[:H]
    mw_edge = mw1[H:H + edge_dim]
    mw_dst = mw1[H + edge_dim:]
    mw2_row = params["mw2"].T                       # (1, H)

    cap = _vmem_cap_bytes()
    vmem = pl.BlockSpec(memory_space=pltpu.MemorySpace.VMEM)

    # ---- call 1: conv1 -> relu -> conv2 -> relu -> h@W_src / h@W_dst -------------- #
    node_vmem = int(min(cap, max(32 << 20, 32 * N * N + 64 * N * f_max + (4 << 20))))
    hs, hd = pl.pallas_call(
        node_embed_kernel,
        out_shape=(jax.ShapeDtypeStruct((N, H), jnp.float32),
                   jax.ShapeDtypeStruct((N, H), jnp.float32)),
        in_specs=[vmem] * 12,
        out_specs=(vmem, vmem),
        compiler_params=pltpu.CompilerParams(vmem_limit_bytes=node_vmem),
    )(x, adj,
      params["w1"], params["attl1"], params["attr1"], params["bias1"],
      params["w2"], params["attl2"], params["attr2"], params["bias2"],
      mw_src, mw_dst)

    # ---- call 2: edge MLP over lane-dense edge tiles ("parallel" -> both v7x TCs) - #
    E_pad = ((E + 127) // 128) * 128
    TE = min(512, E_pad)
    E_pad = ((E_pad + TE - 1) // TE) * TE
    pad = E_pad - E
    src_idx = jnp.pad(edge_index[0].astype(jnp.int32), (0, pad)).reshape(E_pad, 1)
    dst_idx = jnp.pad(edge_index[1].astype(jnp.int32), (0, pad)).reshape(E_pad, 1)
    ea_pad = jnp.pad(edge_attr, ((0, pad), (0, 0)))

    edge_vmem = int(min(cap, max(32 << 20,
                                 8 * TE * N + 32 * TE * H + 32 * N * H + (4 << 20))))
    out_row = pl.pallas_call(
        functools.partial(edge_mlp_kernel, n_edges=E),
        out_shape=jax.ShapeDtypeStruct((1, E_pad), jnp.float32),
        grid=(E_pad // TE,),
        in_specs=[
            pl.BlockSpec((TE, 1), lambda i: (i, 0)),          # src indices
            pl.BlockSpec((TE, 1), lambda i: (i, 0)),          # dst indices
            pl.BlockSpec((TE, edge_dim), lambda i: (i, 0)),   # edge_attr tile
            pl.BlockSpec((N, H), lambda i: (0, 0)),           # hs (replicated)
            pl.BlockSpec((N, H), lambda i: (0, 0)),           # hd (replicated)
            pl.BlockSpec((edge_dim, H), lambda i: (0, 0)),    # W_edge
            pl.BlockSpec((1, H), lambda i: (0, 0)),           # b1
            pl.BlockSpec((1, H), lambda i: (0, 0)),           # w2 row
            pl.BlockSpec((1, 1), lambda i: (0, 0)),           # b2
        ],
        out_specs=pl.BlockSpec((1, TE), lambda i: (0, i)),
        compiler_params=pltpu.CompilerParams(
            dimension_semantics=("parallel",), vmem_limit_bytes=edge_vmem),
    )(src_idx, dst_idx, ea_pad, hs, hd, mw_edge, params["mb1"], mw2_row, params["mb2"])

    return out_row[0, :E].reshape(E, 1)


# ----------------------------- pure-JAX reference ------------------------------ #

def _reference_forward(params, x, edge_index, edge_attr):
    N = x.shape[0]
    adj = build_adjacency(edge_index, N)

    def supergat(x, w, al, ar, b):
        xp = x @ w
        logits = xp @ xp.T
        s_src = jnp.sum(xp * al, axis=-1)
        s_dst = jnp.sum(xp * ar, axis=-1)
        e = (s_dst[:, None] + s_src[None, :]) * jax.nn.sigmoid(logits)
        e = jnp.where(e > 0, e, 0.2 * e)
        e = jnp.where(adj > 0, e, -jnp.inf)
        m = jnp.max(e, axis=1, keepdims=True)
        p = jnp.exp(e - m) * adj
        alpha = p / jnp.sum(p, axis=1, keepdims=True)
        return jnp.maximum(alpha @ xp + b, 0.0)

    h = supergat(x, params["w1"], params["attl1"], params["attr1"], params["bias1"])
    h = supergat(h, params["w2"], params["attl2"], params["attr2"], params["bias2"])
    feat = jnp.concatenate([h[edge_index[0]], edge_attr, h[edge_index[1]]], axis=-1)
    hid = jnp.maximum(feat @ params["mw1"] + params["mb1"], 0.0)
    return hid @ params["mw2"] + params["mb2"]


# ----------------------------------- params ------------------------------------ #

def init_params(key, in_channels, emb_channels, hidden_channels, edge_dim):
    ks = jax.random.split(key, 8)

    def glorot(k, shape):
        fan_in, fan_out = shape[0], shape[-1]
        scale = jnp.sqrt(6.0 / (fan_in + fan_out))
        return jax.random.uniform(k, shape, jnp.float32, -scale, scale)

    return {
        # conv1
        "w1": glorot(ks[0], (in_channels, emb_channels)),
        "attl1": glorot(ks[1], (1, emb_channels)),
        "attr1": glorot(ks[2], (1, emb_channels)),
        "bias1": jnp.zeros((1, emb_channels), jnp.float32),
        # conv2
        "w2": glorot(ks[3], (emb_channels, hidden_channels)),
        "attl2": glorot(ks[4], (1, hidden_channels)),
        "attr2": glorot(ks[5], (1, hidden_channels)),
        "bias2": jnp.zeros((1, hidden_channels), jnp.float32),
        # mlp
        "mw1": glorot(ks[6], (2 * hidden_channels + edge_dim, hidden_channels)),
        "mb1": jnp.zeros((1, hidden_channels), jnp.float32),
        "mw2": glorot(ks[7], (hidden_channels, 1)),
        "mb2": jnp.zeros((1, 1), jnp.float32),
    }


if __name__ == "__main__":
    in_channels, emb_channels, hidden_channels, edge_dim = 4, 32, 32, 1
    num_nodes, num_edges = 16, 24

    key = jax.random.PRNGKey(0)
    k_x, k_e, k_a, k_p = jax.random.split(key, 4)

    x = jax.random.normal(k_x, (num_nodes, in_channels), jnp.float32)
    edge_index = jax.random.randint(k_e, (2, num_edges), 0, num_nodes, jnp.int32)
    edge_attr = jax.random.normal(k_a, (num_edges, edge_dim), jnp.float32)

    params = init_params(k_p, in_channels, emb_channels, hidden_channels, edge_dim)

    fwd = jax.jit(edge_prediction_gnn_forward)
    out = jax.block_until_ready(fwd(params, x, edge_index, edge_attr))

    assert out.shape == (num_edges, 1)
    assert bool(jnp.all(jnp.isfinite(out)))

    # bf16 MXU operands + approx reciprocal give ~0.5-1% mixed-precision deviation vs.
    # the pure-f32 reference across the two conv layers + MLP; tolerance set accordingly.
    ref = _reference_forward(params, x, edge_index, edge_attr)
    err = float(jnp.max(jnp.abs(out - ref)))
    tol = 5e-2 * (1.0 + float(jnp.max(jnp.abs(ref))))
    assert err < tol, f"max abs error {err} exceeds tolerance {tol}"

    print("KERNEL_OK")
</pallas_src>

<mosaic_0001>
module attributes {stable_mosaic.version = 11 : i64} {
  func.func @node_embed_kernel(%arg0: memref<16x4xf32, #tpu.memory_space<vmem>>, %arg1: memref<16x16xbf16, #tpu.memory_space<vmem>>, %arg2: memref<4x32xf32, #tpu.memory_space<vmem>>, %arg3: memref<1x32xf32, #tpu.memory_space<vmem>>, %arg4: memref<1x32xf32, #tpu.memory_space<vmem>>, %arg5: memref<1x32xf32, #tpu.memory_space<vmem>>, %arg6: memref<32x32xf32, #tpu.memory_space<vmem>>, %arg7: memref<1x32xf32, #tpu.memory_space<vmem>>, %arg8: memref<1x32xf32, #tpu.memory_space<vmem>>, %arg9: memref<1x32xf32, #tpu.memory_space<vmem>>, %arg10: memref<32x32xf32, #tpu.memory_space<vmem>>, %arg11: memref<32x32xf32, #tpu.memory_space<vmem>>, %arg12: memref<16x32xf32, #tpu.memory_space<vmem>>, %arg13: memref<16x32xf32, #tpu.memory_space<vmem>>) attributes {dimension_semantics = [], scalar_prefetch = 0 : i64, scratch_operands = 0 : i64, tpu.core_type = #tpu.core_type<tc>} {
    %c0 = arith.constant 0 : index
    %c0_0 = arith.constant 0 : index
    %0 = vector.load %arg1[%c0, %c0_0] : memref<16x16xbf16, #tpu.memory_space<vmem>>, vector<16x16xbf16>
    %1 = arith.extf %0 : vector<16x16xbf16> to vector<16x16xf32>
    %cst = arith.constant 0.000000e+00 : f32
    %2 = vector.broadcast %cst : f32 to vector<16x16xf32>
    %3 = arith.cmpf ogt, %1, %2 : vector<16x16xf32>
    %c0_1 = arith.constant 0 : index
    %c0_2 = arith.constant 0 : index
    %4 = vector.load %arg0[%c0_1, %c0_2] : memref<16x4xf32, #tpu.memory_space<vmem>>, vector<16x4xf32>
    %c0_3 = arith.constant 0 : index
    %c0_4 = arith.constant 0 : index
    %5 = vector.load %arg2[%c0_3, %c0_4] : memref<4x32xf32, #tpu.memory_space<vmem>>, vector<4x32xf32>
    %c0_5 = arith.constant 0 : index
    %c0_6 = arith.constant 0 : index
    %6 = vector.load %arg3[%c0_5, %c0_6] : memref<1x32xf32, #tpu.memory_space<vmem>>, vector<1x32xf32>
    %c0_7 = arith.constant 0 : index
    %c0_8 = arith.constant 0 : index
    %7 = vector.load %arg4[%c0_7, %c0_8] : memref<1x32xf32, #tpu.memory_space<vmem>>, vector<1x32xf32>
    %c0_9 = arith.constant 0 : index
    %c0_10 = arith.constant 0 : index
    %8 = vector.load %arg5[%c0_9, %c0_10] : memref<1x32xf32, #tpu.memory_space<vmem>>, vector<1x32xf32>
    %cst_11 = arith.constant dense<0.000000e+00> : vector<16x32xf32>
    %9 = tpu.matmul %4, %5, %cst_11 {dimension_numbers = #tpu.dot_dimension_numbers<[1], [0], [0], [1], [0, 0, 1, 1], [], []>} : vector<16x4xf32>, vector<4x32xf32>, vector<16x32xf32> -> vector<16x32xf32>
    %10 = arith.truncf %9 : vector<16x32xf32> to vector<16x32xbf16>
    %11 = tpu.concatenate %9, %6 in 0 : vector<16x32xf32>, vector<1x32xf32> -> vector<17x32xf32>
    %12 = arith.truncf %11 : vector<17x32xf32> to vector<17x32xbf16>
    %cst_12 = arith.constant dense<0.000000e+00> : vector<17x16xf32>
    %13 = tpu.matmul %12, %10, %cst_12 {dimension_numbers = #tpu.dot_dimension_numbers<[1], [1], [0], [0], [0, 0, 1, 0], [], []>} : vector<17x32xbf16>, vector<16x32xbf16>, vector<17x16xf32> -> vector<17x16xf32>
    %14 = vector.extract_strided_slice %13 {offsets = [0, 0], sizes = [16, 16], strides = [1, 1]} : vector<17x16xf32> to vector<16x16xf32>
    %15 = vector.extract_strided_slice %13 {offsets = [16, 0], sizes = [1, 16], strides = [1, 1]} : vector<17x16xf32> to vector<1x16xf32>
    %16 = vector.broadcast %7 : vector<1x32xf32> to vector<16x32xf32>
    %17 = arith.mulf %9, %16 : vector<16x32xf32>
    %cst_13 = arith.constant dense<0.000000e+00> : vector<16xf32>
    %18 = vector.multi_reduction <add>, %17, %cst_13 [1] : vector<16x32xf32> to vector<16xf32>
    %19 = vector.shape_cast %18 : vector<16xf32> to vector<16x1xf32>
    %20 = vector.broadcast %19 : vector<16x1xf32> to vector<16x16xf32>
    %21 = vector.broadcast %15 : vector<1x16xf32> to vector<16x16xf32>
    %22 = arith.addf %20, %21 : vector<16x16xf32>
    %23 = arith.negf %14 : vector<16x16xf32>
    %24 = math.exp %23 : vector<16x16xf32>
    %cst_14 = arith.constant 1.000000e+00 : f32
    %25 = vector.broadcast %cst_14 : f32 to vector<16x16xf32>
    %26 = arith.addf %25, %24 : vector<16x16xf32>
    %27 = arith.divf %25, %26 : vector<16x16xf32>
    %28 = arith.mulf %22, %27 : vector<16x16xf32>
    %cst_15 = arith.constant 2.000000e-01 : f32
    %29 = vector.broadcast %cst_15 : f32 to vector<16x16xf32>
    %30 = arith.mulf %29, %28 : vector<16x16xf32>
    %31 = arith.maximumf %28, %30 : vector<16x16xf32>
    %cst_16 = arith.constant 0xFF800000 : f32
    %32 = vector.broadcast %cst_16 : f32 to vector<16x16xf32>
    %33 = arith.select %3, %31, %32 : vector<16x16xi1>, vector<16x16xf32>
    %cst_17 = arith.constant dense<0xFF800000> : vector<16xf32>
    %34 = vector.multi_reduction <maximumf>, %33, %cst_17 [1] : vector<16x16xf32> to vector<16xf32>
    %35 = vector.shape_cast %34 : vector<16xf32> to vector<16x1xf32>
    %36 = vector.broadcast %35 : vector<16x1xf32> to vector<16x16xf32>
    %37 = arith.subf %33, %36 : vector<16x16xf32>
    %38 = math.exp %37 : vector<16x16xf32>
    %39 = arith.mulf %38, %1 : vector<16x16xf32>
    %cst_18 = arith.constant dense<0.000000e+00> : vector<16xf32>
    %40 = vector.multi_reduction <add>, %39, %cst_18 [1] : vector<16x16xf32> to vector<16xf32>
    %41 = vector.shape_cast %40 : vector<16xf32> to vector<16x1xf32>
    %42 = tpu.reciprocal %41 {approx = true} : vector<16x1xf32> -> vector<16x1xf32>
    %43 = vector.broadcast %42 : vector<16x1xf32> to vector<16x16xf32>
    %44 = arith.mulf %39, %43 : vector<16x16xf32>
    %45 = arith.truncf %44 : vector<16x16xf32> to vector<16x16xbf16>
    %cst_19 = arith.constant dense<0.000000e+00> : vector<16x32xf32>
    %46 = tpu.matmul %45, %10, %cst_19 {dimension_numbers = #tpu.dot_dimension_numbers<[1], [0], [0], [1], [0, 0, 1, 1], [], []>} : vector<16x16xbf16>, vector<16x32xbf16>, vector<16x32xf32> -> vector<16x32xf32>
    %47 = vector.broadcast %8 : vector<1x32xf32> to vector<16x32xf32>
    %48 = arith.addf %46, %47 : vector<16x32xf32>
    %cst_20 = arith.constant 0.000000e+00 : f32
    %49 = vector.broadcast %cst_20 : f32 to vector<16x32xf32>
    %50 = arith.maximumf %48, %49 : vector<16x32xf32>
    %c0_21 = arith.constant 0 : index
    %c0_22 = arith.constant 0 : index
    %51 = vector.load %arg6[%c0_21, %c0_22] : memref<32x32xf32, #tpu.memory_space<vmem>>, vector<32x32xf32>
    %c0_23 = arith.constant 0 : index
    %c0_24 = arith.constant 0 : index
    %52 = vector.load %arg7[%c0_23, %c0_24] : memref<1x32xf32, #tpu.memory_space<vmem>>, vector<1x32xf32>
    %c0_25 = arith.constant 0 : index
    %c0_26 = arith.constant 0 : index
    %53 = vector.load %arg8[%c0_25, %c0_26] : memref<1x32xf32, #tpu.memory_space<vmem>>, vector<1x32xf32>
    %c0_27 = arith.constant 0 : index
    %c0_28 = arith.constant 0 : index
    %54 = vector.load %arg9[%c0_27, %c0_28] : memref<1x32xf32, #tpu.memory_space<vmem>>, vector<1x32xf32>
    %cst_29 = arith.constant dense<0.000000e+00> : vector<16x32xf32>
    %55 = tpu.matmul %50, %51, %cst_29 {dimension_numbers = #tpu.dot_dimension_numbers<[1], [0], [0], [1], [0, 0, 1, 1], [], []>} : vector<16x32xf32>, vector<32x32xf32>, vector<16x32xf32> -> vector<16x32xf32>
    %56 = arith.truncf %55 : vector<16x32xf32> to vector<16x32xbf16>
    %57 = tpu.concatenate %55, %52 in 0 : vector<16x32xf32>, vector<1x32xf32> -> vector<17x32xf32>
    %58 = arith.truncf %57 : vector<17x32xf32> to vector<17x32xbf16>
    %cst_30 = arith.constant dense<0.000000e+00> : vector<17x16xf32>
    %59 = tpu.matmul %58, %56, %cst_30 {dimension_numbers = #tpu.dot_dimension_numbers<[1], [1], [0], [0], [0, 0, 1, 0], [], []>} : vector<17x32xbf16>, vector<16x32xbf16>, vector<17x16xf32> -> vector<17x16xf32>
    %60 = vector.extract_strided_slice %59 {offsets = [0, 0], sizes = [16, 16], strides = [1, 1]} : vector<17x16xf32> to vector<16x16xf32>
    %61 = vector.extract_strided_slice %59 {offsets = [16, 0], sizes = [1, 16], strides = [1, 1]} : vector<17x16xf32> to vector<1x16xf32>
    %62 = vector.broadcast %53 : vector<1x32xf32> to vector<16x32xf32>
    %63 = arith.mulf %55, %62 : vector<16x32xf32>
    %cst_31 = arith.constant dense<0.000000e+00> : vector<16xf32>
    %64 = vector.multi_reduction <add>, %63, %cst_31 [1] : vector<16x32xf32> to vector<16xf32>
    %65 = vector.shape_cast %64 : vector<16xf32> to vector<16x1xf32>
    %66 = vector.broadcast %65 : vector<16x1xf32> to vector<16x16xf32>
    %67 = vector.broadcast %61 : vector<1x16xf32> to vector<16x16xf32>
    %68 = arith.addf %66, %67 : vector<16x16xf32>
    %69 = arith.negf %60 : vector<16x16xf32>
    %70 = math.exp %69 : vector<16x16xf32>
    %cst_32 = arith.constant 1.000000e+00 : f32
    %71 = vector.broadcast %cst_32 : f32 to vector<16x16xf32>
    %72 = arith.addf %71, %70 : vector<16x16xf32>
    %73 = arith.divf %71, %72 : vector<16x16xf32>
    %74 = arith.mulf %68, %73 : vector<16x16xf32>
    %cst_33 = arith.constant 2.000000e-01 : f32
    %75 = vector.broadcast %cst_33 : f32 to vector<16x16xf32>
    %76 = arith.mulf %75, %74 : vector<16x16xf32>
    %77 = arith.maximumf %74, %76 : vector<16x16xf32>
    %cst_34 = arith.constant 0xFF800000 : f32
    %78 = vector.broadcast %cst_34 : f32 to vector<16x16xf32>
    %79 = arith.select %3, %77, %78 : vector<16x16xi1>, vector<16x16xf32>
    %cst_35 = arith.constant dense<0xFF800000> : vector<16xf32>
    %80 = vector.multi_reduction <maximumf>, %79, %cst_35 [1] : vector<16x16xf32> to vector<16xf32>
    %81 = vector.shape_cast %80 : vector<16xf32> to vector<16x1xf32>
    %82 = vector.broadcast %81 : vector<16x1xf32> to vector<16x16xf32>
    %83 = arith.subf %79, %82 : vector<16x16xf32>
    %84 = math.exp %83 : vector<16x16xf32>
    %85 = arith.mulf %84, %1 : vector<16x16xf32>
    %cst_36 = arith.constant dense<0.000000e+00> : vector<16xf32>
    %86 = vector.multi_reduction <add>, %85, %cst_36 [1] : vector<16x16xf32> to vector<16xf32>
    %87 = vector.shape_cast %86 : vector<16xf32> to vector<16x1xf32>
    %88 = tpu.reciprocal %87 {approx = true} : vector<16x1xf32> -> vector<16x1xf32>
    %89 = vector.broadcast %88 : vector<16x1xf32> to vector<16x16xf32>
    %90 = arith.mulf %85, %89 : vector<16x16xf32>
    %91 = arith.truncf %90 : vector<16x16xf32> to vector<16x16xbf16>
    %cst_37 = arith.constant dense<0.000000e+00> : vector<16x32xf32>
    %92 = tpu.matmul %91, %56, %cst_37 {dimension_numbers = #tpu.dot_dimension_numbers<[1], [0], [0], [1], [0, 0, 1, 1], [], []>} : vector<16x16xbf16>, vector<16x32xbf16>, vector<16x32xf32> -> vector<16x32xf32>
    %93 = vector.broadcast %54 : vector<1x32xf32> to vector<16x32xf32>
    %94 = arith.addf %92, %93 : vector<16x32xf32>
    %cst_38 = arith.constant 0.000000e+00 : f32
    %95 = vector.broadcast %cst_38 : f32 to vector<16x32xf32>
    %96 = arith.maximumf %94, %95 : vector<16x32xf32>
    %c0_39 = arith.constant 0 : index
    %c0_40 = arith.constant 0 : index
    %97 = vector.load %arg10[%c0_39, %c0_40] : memref<32x32xf32, #tpu.memory_space<vmem>>, vector<32x32xf32>
    %cst_41 = arith.constant dense<0.000000e+00> : vector<16x32xf32>
    %98 = tpu.matmul %96, %97, %cst_41 {dimension_numbers = #tpu.dot_dimension_numbers<[1], [0], [0], [1], [0, 0, 1, 1], [], []>} : vector<16x32xf32>, vector<32x32xf32>, vector<16x32xf32> -> vector<16x32xf32>
    %c0_42 = arith.constant 0 : index
    %c0_43 = arith.constant 0 : index
    %99 = vector.load %arg12[%c0_42, %c0_43] : memref<16x32xf32, #tpu.memory_space<vmem>>, vector<16x32xf32>
    tpu.vector_store %arg12[%c0_42, %c0_43], %98 {strides = array<i32>} : memref<16x32xf32, #tpu.memory_space<vmem>>, vector<16x32xf32>,
    %c0_44 = arith.constant 0 : index
    %c0_45 = arith.constant 0 : index
    %100 = vector.load %arg11[%c0_44, %c0_45] : memref<32x32xf32, #tpu.memory_space<vmem>>, vector<32x32xf32>
    %cst_46 = arith.constant dense<0.000000e+00> : vector<16x32xf32>
    %101 = tpu.matmul %96, %100, %cst_46 {dimension_numbers = #tpu.dot_dimension_numbers<[1], [0], [0], [1], [0, 0, 1, 1], [], []>} : vector<16x32xf32>, vector<32x32xf32>, vector<16x32xf32> -> vector<16x32xf32>
    %c0_47 = arith.constant 0 : index
    %c0_48 = arith.constant 0 : index
    %102 = vector.load %arg13[%c0_47, %c0_48] : memref<16x32xf32, #tpu.memory_space<vmem>>, vector<16x32xf32>
    tpu.vector_store %arg13[%c0_47, %c0_48], %101 {strides = array<i32>} : memref<16x32xf32, #tpu.memory_space<vmem>>, vector<16x32xf32>,
    return
  }
}

module attributes {stable_mosaic.version = 11 : i64} {
  func.func @edge_mlp_kernel(%arg0: i32, %arg1: memref<128x1xi32, #tpu.memory_space<vmem>>, %arg2: memref<128x1xi32, #tpu.memory_space<vmem>>, %arg3: memref<128x1xf32, #tpu.memory_space<vmem>>, %arg4: memref<16x32xf32, #tpu.memory_space<vmem>>, %arg5: memref<16x32xf32, #tpu.memory_space<vmem>>, %arg6: memref<1x32xf32, #tpu.memory_space<vmem>>, %arg7: memref<1x32xf32, #tpu.memory_space<vmem>>, %arg8: memref<1x32xf32, #tpu.memory_space<vmem>>, %arg9: memref<1x1xf32, #tpu.memory_space<vmem>>, %arg10: memref<1x128xf32, #tpu.memory_space<vmem>>) attributes {dimension_semantics = [#tpu.dimension_semantics<parallel>], iteration_bounds = array<i64: 1>, scalar_prefetch = 0 : i64, scratch_operands = 0 : i64, tpu.core_type = #tpu.core_type<tc>, window_params = [{transform_indices = @transform_0, window_bounds = array<i64: 128, 1>}, {transform_indices = @transform_1, window_bounds = array<i64: 128, 1>}, {transform_indices = @transform_2, window_bounds = array<i64: 128, 1>}, {pipeline_mode = #tpu.pipeline_mode<synchronous>, transform_indices = @transform_3, window_bounds = array<i64: 16, 32>}, {pipeline_mode = #tpu.pipeline_mode<synchronous>, transform_indices = @transform_4, window_bounds = array<i64: 16, 32>}, {pipeline_mode = #tpu.pipeline_mode<synchronous>, transform_indices = @transform_5, window_bounds = array<i64: 1, 32>}, {pipeline_mode = #tpu.pipeline_mode<synchronous>, transform_indices = @transform_6, window_bounds = array<i64: 1, 32>}, {pipeline_mode = #tpu.pipeline_mode<synchronous>, transform_indices = @transform_7, window_bounds = array<i64: 1, 32>}, {pipeline_mode = #tpu.pipeline_mode<synchronous>, transform_indices = @transform_8, window_bounds = array<i64: 1, 1>}, {transform_indices = @transform_9, window_bounds = array<i64: 1, 128>}]} {
    %0 = tpu.iota {dimensions = array<i32: 1>} : vector<128x16xi32>
    %c0 = arith.constant 0 : index
    %c0_0 = arith.constant 0 : index
    %1 = vector.load %arg1[%c0, %c0_0] : memref<128x1xi32, #tpu.memory_space<vmem>>, vector<128x1xi32>
    %2 = vector.broadcast %1 : vector<128x1xi32> to vector<128x16xi32>
    %3 = arith.cmpi eq, %0, %2 : vector<128x16xi32>
    %4 = arith.extui %3 : vector<128x16xi1> to vector<128x16xi32>
    %5 = arith.sitofp %4 : vector<128x16xi32> to vector<128x16xf32>
    %6 = arith.truncf %5 : vector<128x16xf32> to vector<128x16xbf16>
    %c0_1 = arith.constant 0 : index
    %c0_2 = arith.constant 0 : index
    %7 = vector.load %arg2[%c0_1, %c0_2] : memref<128x1xi32, #tpu.memory_space<vmem>>, vector<128x1xi32>
    %8 = vector.broadcast %7 : vector<128x1xi32> to vector<128x16xi32>
    %9 = arith.cmpi eq, %0, %8 : vector<128x16xi32>
    %10 = arith.extui %9 : vector<128x16xi1> to vector<128x16xi32>
    %11 = arith.sitofp %10 : vector<128x16xi32> to vector<128x16xf32>
    %12 = arith.truncf %11 : vector<128x16xf32> to vector<128x16xbf16>
    %c0_3 = arith.constant 0 : index
    %c0_4 = arith.constant 0 : index
    %13 = vector.load %arg4[%c0_3, %c0_4] : memref<16x32xf32, #tpu.memory_space<vmem>>, vector<16x32xf32>
    %14 = arith.truncf %13 : vector<16x32xf32> to vector<16x32xbf16>
    %cst = arith.constant dense<0.000000e+00> : vector<128x32xf32>
    %15 = tpu.matmul %6, %14, %cst {dimension_numbers = #tpu.dot_dimension_numbers<[1], [0], [0], [1], [0, 0, 1, 1], [], []>} : vector<128x16xbf16>, vector<16x32xbf16>, vector<128x32xf32> -> vector<128x32xf32>
    %c0_5 = arith.constant 0 : index
    %c0_6 = arith.constant 0 : index
    %16 = vector.load %arg5[%c0_5, %c0_6] : memref<16x32xf32, #tpu.memory_space<vmem>>, vector<16x32xf32>
    %17 = arith.truncf %16 : vector<16x32xf32> to vector<16x32xbf16>
    %cst_7 = arith.constant dense<0.000000e+00> : vector<128x32xf32>
    %18 = tpu.matmul %12, %17, %cst_7 {dimension_numbers = #tpu.dot_dimension_numbers<[1], [0], [0], [1], [0, 0, 1, 1], [], []>} : vector<128x16xbf16>, vector<16x32xbf16>, vector<128x32xf32> -> vector<128x32xf32>
    %c0_8 = arith.constant 0 : index
    %c0_9 = arith.constant 0 : index
    %19 = vector.load %arg3[%c0_8, %c0_9] : memref<128x1xf32, #tpu.memory_space<vmem>>, vector<128x1xf32>
    %c0_10 = arith.constant 0 : index
    %c0_11 = arith.constant 0 : index
    %20 = vector.load %arg6[%c0_10, %c0_11] : memref<1x32xf32, #tpu.memory_space<vmem>>, vector<1x32xf32>
    %cst_12 = arith.constant dense<0.000000e+00> : vector<128x32xf32>
    %21 = tpu.matmul %19, %20, %cst_12 {dimension_numbers = #tpu.dot_dimension_numbers<[1], [0], [0], [1], [0, 0, 1, 1], [], []>} : vector<128x1xf32>, vector<1x32xf32>, vector<128x32xf32> -> vector<128x32xf32>
    %22 = arith.addf %15, %21 : vector<128x32xf32>
    %23 = arith.addf %22, %18 : vector<128x32xf32>
    %c0_13 = arith.constant 0 : index
    %c0_14 = arith.constant 0 : index
    %24 = vector.load %arg7[%c0_13, %c0_14] : memref<1x32xf32, #tpu.memory_space<vmem>>, vector<1x32xf32>
    %25 = vector.broadcast %24 : vector<1x32xf32> to vector<128x32xf32>
    %26 = arith.addf %23, %25 : vector<128x32xf32>
    %cst_15 = arith.constant 0.000000e+00 : f32
    %27 = vector.broadcast %cst_15 : f32 to vector<128x32xf32>
    %28 = arith.maximumf %26, %27 : vector<128x32xf32>
    %c0_16 = arith.constant 0 : index
    %c0_17 = arith.constant 0 : index
    %29 = vector.load %arg8[%c0_16, %c0_17] : memref<1x32xf32, #tpu.memory_space<vmem>>, vector<1x32xf32>
    %cst_18 = arith.constant dense<0.000000e+00> : vector<1x128xf32>
    %30 = tpu.matmul %29, %28, %cst_18 {dimension_numbers = #tpu.dot_dimension_numbers<[1], [1], [0], [0], [0, 0, 1, 0], [], []>} : vector<1x32xf32>, vector<128x32xf32>, vector<1x128xf32> -> vector<1x128xf32>
    %c0_19 = arith.constant 0 : index
    %c0_20 = arith.constant 0 : index
    %31 = vector.load %arg9[%c0_19, %c0_20] : memref<1x1xf32, #tpu.memory_space<vmem>>, vector<1x1xf32>
    %32 = vector.broadcast %31 : vector<1x1xf32> to vector<1x128xf32>
    %33 = arith.addf %30, %32 : vector<1x128xf32>
    %c128_i32 = arith.constant 128 : i32
    %34 = arith.muli %arg0, %c128_i32 : i32
    %35 = tpu.iota {dimensions = array<i32: 1>} : vector<1x128xi32>
    %36 = vector.broadcast %34 : i32 to vector<1x128xi32>
    %37 = arith.addi %36, %35 : vector<1x128xi32>
    %c24_i32 = arith.constant 24 : i32
    %38 = vector.broadcast %c24_i32 : i32 to vector<1x128xi32>
    %39 = arith.cmpi slt, %37, %38 : vector<1x128xi32>
    %cst_21 = arith.constant 0.000000e+00 : f32
    %40 = vector.broadcast %cst_21 : f32 to vector<1x128xf32>
    %41 = arith.select %39, %33, %40 : vector<1x128xi1>, vector<1x128xf32>
    %c0_22 = arith.constant 0 : index
    %c0_23 = arith.constant 0 : index
    %42 = vector.load %arg10[%c0_22, %c0_23] : memref<1x128xf32, #tpu.memory_space<vmem>>, vector<1x128xf32>
    tpu.vector_store %arg10[%c0_22, %c0_23], %41 {strides = array<i32>} : memref<1x128xf32, #tpu.memory_space<vmem>>, vector<1x128xf32>,
    return
  }
  func.func @transform_0(%arg0: i32) -> (i32, i32) {
    %c0_i32 = arith.constant 0 : i32
    %c0_i32_0 = arith.constant 0 : i32
    return %arg0, %c0_i32 : i32, i32
  }
  func.func @transform_1(%arg0: i32) -> (i32, i32) {
    %c0_i32 = arith.constant 0 : i32
    %c0_i32_0 = arith.constant 0 : i32
    return %arg0, %c0_i32 : i32, i32
  }
  func.func @transform_2(%arg0: i32) -> (i32, i32) {
    %c0_i32 = arith.constant 0 : i32
    %c0_i32_0 = arith.constant 0 : i32
    return %arg0, %c0_i32 : i32, i32
  }
  func.func @transform_3(%arg0: i32) -> (i32, i32) {
    %c0_i32 = arith.constant 0 : i32
    %c0_i32_0 = arith.constant 0 : i32
    %c0_i32_1 = arith.constant 0 : i32
    return %c0_i32, %c0_i32_0 : i32, i32
  }
  func.func @transform_4(%arg0: i32) -> (i32, i32) {
    %c0_i32 = arith.constant 0 : i32
    %c0_i32_0 = arith.constant 0 : i32
    %c0_i32_1 = arith.constant 0 : i32
    return %c0_i32, %c0_i32_0 : i32, i32
  }
  func.func @transform_5(%arg0: i32) -> (i32, i32) {
    %c0_i32 = arith.constant 0 : i32
    %c0_i32_0 = arith.constant 0 : i32
    %c0_i32_1 = arith.constant 0 : i32
    return %c0_i32, %c0_i32_0 : i32, i32
  }
  func.func @transform_6(%arg0: i32) -> (i32, i32) {
    %c0_i32 = arith.constant 0 : i32
    %c0_i32_0 = arith.constant 0 : i32
    %c0_i32_1 = arith.constant 0 : i32
    return %c0_i32, %c0_i32_0 : i32, i32
  }
  func.func @transform_7(%arg0: i32) -> (i32, i32) {
    %c0_i32 = arith.constant 0 : i32
    %c0_i32_0 = arith.constant 0 : i32
    %c0_i32_1 = arith.constant 0 : i32
    return %c0_i32, %c0_i32_0 : i32, i32
  }
  func.func @transform_8(%arg0: i32) -> (i32, i32) {
    %c0_i32 = arith.constant 0 : i32
    %c0_i32_0 = arith.constant 0 : i32
    %c0_i32_1 = arith.constant 0 : i32
    return %c0_i32, %c0_i32_0 : i32, i32
  }
  func.func @transform_9(%arg0: i32) -> (i32, i32) {
    %c0_i32 = arith.constant 0 : i32
    %c0_i32_0 = arith.constant 0 : i32
    return %c0_i32, %arg0 : i32, i32
  }
}

</mosaic_0001>

<bundles_post_ra>
// kernel: edge_prediction_gnn_forward.2
= control target key start
LH: loop header
LB: loop body
LE: loop exit
PB: predicated region body
PF: predicated region fallthrough
CT: control target
= control target key end

     0   :  { %vm63_vm0 = vcmask 1043456   ;;  %vm56_vm1 = vcmask 31744   ;;  %v934_v3 = vmov 0.0   ;;  %vm144_vm2 = vcmask 261120   ;;  %s1147_s2 = inlined_call_operand.vmem [shape: f32[4,32], index: 2, kind: input, shape index: {}]   ;;  %s1148_s0 = inlined_call_operand.vmem [shape: f32[16,4], index: 0, kind: input, shape index: {}]   ;;  %s1149_s4 = inlined_call_operand.vmem [shape: f32[1,32], index: 4, kind: input, shape index: {}]   ;;  %s1150_s3 = inlined_call_operand.vmem [shape: f32[1,32], index: 3, kind: input, shape index: {}]   ;;  %s1151_s1 = inlined_call_operand.vmem [shape: bf16[16,16], index: 1, kind: input, shape index: {}]   ;;  %s1152_s6 = inlined_call_operand.vmem [shape: f32[32,32], index: 6, kind: input, shape index: {}]   ;;  %s1153_s5 = inlined_call_operand.vmem [shape: f32[1,32], index: 5, kind: input, shape index: {}]   ;;  %s1154_s8 = inlined_call_operand.vmem [shape: f32[1,32], index: 8, kind: input, shape index: {}]   ;;  %s1155_s7 = inlined_call_operand.vmem [shape: f32[1,32], index: 7, kind: input, shape index: {}]   ;;  %s1156_s10 = inlined_call_operand.vmem [shape: f32[32,32], index: 10, kind: input, shape index: {}]   ;;  %s1157_s11 = inlined_call_operand.vmem [shape: f32[32,32], index: 11, kind: input, shape index: {}]   ;;  %s1158_s9 = inlined_call_operand.vmem [shape: f32[1,32], index: 9, kind: input, shape index: {}]   ;;  %s1159_s12 = inlined_call_operand.vmem [shape: f32[16,32], index: 12, kind: output, shape index: {0}]   ;;  %s1160_s13 = inlined_call_operand.vmem [shape: f32[16,32], index: 13, kind: output, shape index: {1}]  }
   0x1   :  { %v52_v0 = vld [vmem:[%s1147_s2] sm:$0xf]  ;;  %v51_v2 = vld [vmem:[%s1148_s0 + $0x8] sm:$0xff]  ;;  %v213_v21 = vlaneseq  ;;  %vm239_vm4 = vcmask 130048   ;;  %vm935_vm6 = vmmov 0  }
   0x2   :  { %v50_v1 = vld [vmem:[%s1148_s0] sm:$0xff]  ;;  %812 = vmatprep.subr.msk.mxu0 %vm63_vm0, %v52_v0  ;;  %v318_v61 = vld [vmem:[%s1152_s6 + $0x8] sm:$0xff] }
   0x3   :  { %814 = vmatprep.mubr.msk.f32.mxu0 %vm56_vm1, %v50_v1  ;;  %813 = vmatpush3.msk.msra.mxu0 %vm63_vm0, %v52_v0  ;;  %v759_v4 = vld [vmem:[%s1149_s4] ss:$0 sm:$0xff]  ;;  %v1028_v23 = vshrl.u32 %v213_v21, 7 }
   0x4   :  { %815 = vmatmul.mubr.msk.f32.vlgmr.msra.gmra.mrb[0].mxu0 %vm56_vm1, %v51_v2  ;;  %823 = vmatprep.subr.bf16.mxu0 %v934_v3  ;;  %v53_v12 = vld [vmem:[%s1150_s3] sm:$0x1] }
   0x5   :  { %v143_v14 = vpack.c.bf16 %v53_v12, %v53_v12  ;;  %v215_v27 = vsub.s32 0, %v1028_v23  ;;  %v778_v30 = vld [vmem:[%s1151_s1] sm:$0xff]   ;;  %825 = vmatprep.mubr.msk.bf16.mxu0 %vm935_vm6, %v934_v3 }
   0x6   :  { %v1036_v34 = vunpack.c.l.bf16 %v778_v30  ;;  %v1038_v38 = vunpack.c.h.bf16 %v778_v30  ;;  %v317_v60 = vld [vmem:[%s1152_s6] sm:$0xff] }
   0x7   :  { %v874_v62 = vpack.c.bf16 %v318_v61, %v317_v60 }
   0x8   :  { %vm48_vm3 = vcmp.gt.f32.partialorder %v1036_v34, 0.0  ;;  %vm49_vm5 = vcmp.gt.f32.partialorder %v1038_v38, 0.0 }
  0xd7   :  { %v816_v5 = vpop.f32.mrb[0].mxu0 }
  0xd8   :  { %v133_v6 = vpop.f32.mrb[1].mxu0  ;;  %v206_v9 = vmul.f32 %v816_v5, %v759_v4 }
  0xd9   :  { %v142_v7 = vpack.c.bf16 %v816_v5, %v133_v6  ;;  %v205_v8 = vmul.f32 %v759_v4, %v133_v6 }
  0xda   :  { %v210_v13 = vsel %vm144_vm2, %v206_v9, 0.0 }
  0xdb   :  { %898 = vmatprep.subr.msk.bf16.mxu1 %vm144_vm2, %v142_v7  ;;  %819 = vmatprep.mubr.msk.bf16.mxu1 %vm144_vm2, %v142_v7  ;;  %v207_v10 = vsel %vm144_vm2, %v205_v8, 0.0  ;;  %v146_v11 = vsel %vm144_vm2, %v142_v7, 0  ;;  %v320_v8 = vld [vmem:[%s1152_s6 + $0x18] sm:$0xff] }
  0xdc   :  { %824 = vmatpush3.bf16.msra.mxu0 %v142_v7  ;;  %208 = vadd.xlane.f32.xlu0 %v207_v10  ;;  %v319_v7 = vld [vmem:[%s1152_s6 + $0x10] sm:$0xff]  ;;  %v762_v10 = vld [vmem:[%s1153_s5] ss:$0 sm:$0xff] }
  0xdd   :  { %818 = vmatpush3.bf16.xpose.msra.mxu1 %v146_v11  ;;  %875 = vmatprep.subr.bf16.mxu0 %v874_v62  ;;  %v878_v9 = vpack.c.bf16 %v320_v8, %v319_v7  ;;  %v578_v7 = vld [vmem:[%s1156_s10] sm:$0xff]  ;;  %v579_v8 = vld [vmem:[%s1156_s10 + $0x8] sm:$0xff] }
  0xe0   :  { %211 = vadd.xlane.f32.xlu0 %v210_v13 }
  0xe4   :  { %820 = vmatmul.mubr.msk.bf16.vlgmr.msra.gmra.mrb[0].mxu1 %vm144_vm2, %v143_v14 }
 0x169   :  { %v209_v28 = vpop.xlane.xlu0 %208 }
 0x16d   :  { %v212_v33 = vpop.xlane.xlu0 %211 }
 0x1b7   :  { %v821_v15 = vpop.f32.mrb[0].mxu1 }
 0x1b8   :  { %v185_v16 = vpop.f32.mrb[1].mxu1  ;;  %v216_v29 = vrot.slane %v821_v15, %v215_v27 }
 0x1b9   :  { %v760_v17 = vmul.f32 -1.442695, %v185_v16  ;;  %v822_v18 = vpop.f32.mrb[2].mxu1 }
 0x1ba   :  { %v188_v19 = vpop.f32.mrb[3].mxu1  ;;  %v217_v31 = vadd.f32 %v216_v29, %v209_v28  ;;  %v218_v35 = vadd.f32 %v216_v29, %v212_v33 }
 0x1bb   :  { %902 = vpow2.f32 %v760_v17  ;;  %v761_v20 = vmul.f32 -1.442695, %v188_v19  ;;  %v768_v19 = vld [vmem:[%s1154_s8] ss:$0 sm:$0xff] }
 0x1bd   :  { %904 = vpow2.f32 %v761_v20 }
 0x1c5   :  { %v903_v22 = vpop.eup %902 }
 0x1c6   :  { %v225_v24 = vadd.f32 1.0, %v903_v22 }
 0x1c7   :  { %v905_v25 = vpop.eup %904 }
 0x1c8   :  { %906 = vrcp.f32 %v225_v24  ;;  %v226_v26 = vadd.f32 1.0, %v905_v25 }
 0x1ca   :  { %908 = vrcp.f32 %v226_v26 }
 0x1d2   :  { %v907_v32 = vpop.eup %906 }
 0x1d3   :  { %v231_v36 = vmul.f32 %v907_v32, %v217_v31 }
 0x1d4   :  { %v909_v37 = vpop.eup %908 }
 0x1d5   :  { %v233_v39 = vmul.f32 0.2, %v231_v36  ;;  %v232_v40 = vmul.f32 %v909_v37, %v218_v35 }
 0x1d7   :  { %v235_v41 = vmax.f32 %v231_v36, %v233_v39  ;;  %v234_v42 = vmul.f32 0.2, %v232_v40 }
 0x1d9   :  { %v237_v43 = vsel %vm48_vm3, %v235_v41, -inf  ;;  %v236_v44 = vmax.f32 %v232_v40, %v234_v42 }
 0x1da   :  { %v240_v45 = vsel %vm239_vm4, %v237_v43, -inf }
 0x1db   :  { %241 = vmax.xlane.f32.xlu1 %v240_v45  ;;  %v238_v46 = vsel %vm49_vm5, %v236_v44, -inf }
 0x1dc   :  { %v243_v47 = vsel %vm239_vm4, %v238_v46, -inf }
 0x1df   :  { %244 = vmax.xlane.f32.xlu1 %v243_v47 }
 0x268   :  { %v242_v48 = vpop.xlane.xlu1 %241 }
 0x269   :  { %v246_v49 = vsub.f32 %v237_v43, %v242_v48 }
 0x26b   :  { %v248_v50 = vmul.f32 1.442695, %v246_v49 }
 0x26c   :  { %v245_v51 = vpop.xlane.xlu1 %244 }
 0x26d   :  { %910 = vpow2.f32 %v248_v50  ;;  %v247_v52 = vsub.f32 %v238_v46, %v245_v51 }
 0x26f   :  { %v250_v53 = vmul.f32 1.442695, %v247_v52 }
 0x271   :  { %912 = vpow2.f32 %v250_v53 }
 0x277   :  { %v911_v54 = vpop.eup %910 }
 0x278   :  { %v252_v55 = vmul.f32 %v911_v54, %v1036_v34 }
 0x27a   :  { %v254_v56 = vsel %vm239_vm4, %v252_v55, 0.0 }
 0x27b   :  { %v913_v57 = vpop.eup %912  ;;  %255 = vadd.xlane.f32.xlu0 %v254_v56 }
 0x27c   :  { %v253_v58 = vmul.f32 %v913_v57, %v1038_v38 }
 0x27e   :  { %v257_v59 = vsel %vm239_vm4, %v253_v58, 0.0 }
 0x27f   :  { %258 = vadd.xlane.f32.xlu1 %v257_v59 }
 0x308   :  { %v256_v63 = vpop.xlane.xlu0 %255 }
 0x309   :  { %914 = vrcp.f32 %v256_v63 }
 0x30c   :  { %v259_v0 = vpop.xlane.xlu1 %258 }
 0x30d   :  { %916 = vrcp.f32 %v259_v0 }
 0x313   :  { %v915_v1 = vpop.eup %914 }
 0x314   :  { %v262_v4 = vmul.f32 %v915_v1, %v252_v55 }
 0x317   :  { %v917_v2 = vpop.eup %916 }
 0x318   :  { %v263_v5 = vmul.f32 %v917_v2, %v253_v58 }
 0x31a   :  { %v264_v6 = vpack.c.bf16 %v263_v5, %v262_v4 }
 0x31c   :  { %826 = vmatmul.mubr.msk.bf16.vlgmr.msra.gmra.mrb[4].mxu0 %vm239_vm4, %v264_v6 }
 0x31d   :  { %877 = vmatpush3.bf16.msra.mxu0 %v874_v62 }
 0x31e   :  { %879 = vmatprep.subr.bf16.mxu0 %v878_v9 }
 0x321   :  { %881 = vmatpush3.bf16.msra.mxu0 %v878_v9  ;;  %v882_v9 = vpack.c.bf16 %v579_v8, %v578_v7 }
 0x322   :  { %846 = vmatprep.subr.bf16.mxu0 %v934_v3 }
 0x3ef   :  { %v308_v11 = vpop.f32.mrb[4].mxu0 }
 0x3f0   :  { %v309_v12 = vadd.f32 %v762_v10, %v308_v11  ;;  %v827_v13 = vpop.f32.mrb[5].mxu0 }
 0x3f1   :  { %v311_v14 = vpop.f32.mrb[6].mxu0 }
 0x3f2   :  { %v315_v15 = vmax.f32 %v309_v12, 0.0  ;;  %v312_v16 = vadd.f32 %v762_v10, %v311_v14  ;;  %v828_v17 = vpop.f32.mrb[7].mxu0 }
 0x3f4   :  { %v316_v18 = vmax.f32 %v312_v16, 0.0  ;;  %837 = vmatprep.mubr.msk.f32.mxu0 %vm144_vm2, %v315_v15 }
 0x3f6   :  { %838 = vmatmul.mubr.msk.f32.vlgmr.msra.gmra.mrb[2].mxu0 %vm144_vm2, %v316_v18  ;;  %v580_v18 = vld [vmem:[%s1156_s10 + $0x10] sm:$0xff] }
 0x3f7   :  { %848 = vmatprep.mubr.msk.bf16.mxu0 %vm935_vm6, %v934_v3  ;;  %v321_v3 = vld [vmem:[%s1155_s7] sm:$0x1] }
 0x3f8   :  { %v406_v30 = vpack.c.bf16 %v321_v3, %v321_v3 }
 0x4c9   :  { %v839_v20 = vpop.f32.mrb[2].mxu0 }
 0x4ca   :  { %v468_v21 = vmul.f32 %v839_v20, %v768_v19  ;;  %v396_v22 = vpop.f32.mrb[3].mxu0 }
 0x4cb   :  { %v405_v24 = vpack.c.bf16 %v839_v20, %v396_v22  ;;  %v467_v25 = vmul.f32 %v768_v19, %v396_v22  ;;  %v581_v19 = vld [vmem:[%s1156_s10 + $0x18] sm:$0xff]  ;;  %v667_v20 = vld [vmem:[%s1157_s11 + $0x10] sm:$0xff] }
 0x4cc   :  { %v472_v26 = vsel %vm144_vm2, %v468_v21, 0.0  ;;  %v886_v21 = vpack.c.bf16 %v581_v19, %v580_v18  ;;  %v668_v22 = vld [vmem:[%s1157_s11 + $0x18] sm:$0xff] }
 0x4cd   :  { %473 = vadd.xlane.f32.xlu1 %v472_v26  ;;  %899 = vmatprep.subr.msk.bf16.mxu1 %vm144_vm2, %v405_v24  ;;  %v469_v28 = vsel %vm144_vm2, %v467_v25, 0.0  ;;  %v408_v29 = vsel %vm144_vm2, %v405_v24, 0  ;;  %v771_v25 = vld [vmem:[%s1158_s9] ss:$0 sm:$0xff] }
 0x4ce   :  { %842 = vmatprep.mubr.msk.bf16.mxu1 %vm144_vm2, %v405_v24  ;;  %847 = vmatpush3.bf16.msra.mxu0 %v405_v24  ;;  %v894_v24 = vpack.c.bf16 %v668_v22, %v667_v20 }
 0x4cf   :  { %470 = vadd.xlane.f32.xlu0 %v469_v28  ;;  %841 = vmatpush3.bf16.xpose.msra.mxu1 %v408_v29 }
 0x4d0   :  { %883 = vmatprep.subr.bf16.mxu1 %v882_v9 }
 0x4d6   :  { %843 = vmatmul.mubr.msk.bf16.vlgmr.msra.gmra.mrb[4].mxu1 %vm144_vm2, %v406_v30 }
 0x4d7   :  { %885 = vmatpush3.bf16.msra.mxu1 %v882_v9 }
 0x4d8   :  { %887 = vmatprep.subr.bf16.mxu1 %v886_v21 }
 0x4db   :  { %889 = vmatpush3.bf16.msra.mxu1 %v886_v21 }
 0x55a   :  { %v474_v47 = vpop.xlane.xlu1 %473 }
 0x55c   :  { %v471_v44 = vpop.xlane.xlu0 %470 }
 0x5a9   :  { %v844_v31 = vpop.f32.mrb[4].mxu1 }
 0x5aa   :  { %v447_v32 = vpop.f32.mrb[5].mxu1  ;;  %v478_v43 = vrot.slane %v844_v31, %v215_v27 }
 0x5ab   :  { %v769_v33 = vmul.f32 -1.442695, %v447_v32  ;;  %v845_v35 = vpop.f32.mrb[6].mxu1 }
 0x5ac   :  { %v450_v36 = vpop.f32.mrb[7].mxu1  ;;  %v479_v45 = vadd.f32 %v478_v43, %v471_v44  ;;  %v480_v48 = vadd.f32 %v478_v43, %v474_v47 }
 0x5ad   :  { %918 = vpow2.f32 %v769_v33  ;;  %v770_v37 = vmul.f32 -1.442695, %v450_v36 }
 0x5af   :  { %920 = vpow2.f32 %v770_v37 }
 0x5b7   :  { %v919_v39 = vpop.eup %918 }
 0x5b8   :  { %v487_v40 = vadd.f32 1.0, %v919_v39 }
 0x5b9   :  { %v921_v41 = vpop.eup %920 }
 0x5ba   :  { %922 = vrcp.f32 %v487_v40  ;;  %v488_v42 = vadd.f32 1.0, %v921_v41 }
 0x5bc   :  { %924 = vrcp.f32 %v488_v42 }
 0x5c4   :  { %v923_v46 = vpop.eup %922 }
 0x5c5   :  { %v493_v49 = vmul.f32 %v923_v46, %v479_v45 }
 0x5c6   :  { %v925_v50 = vpop.eup %924 }
 0x5c7   :  { %v495_v51 = vmul.f32 0.2, %v493_v49  ;;  %v494_v52 = vmul.f32 %v925_v50, %v480_v48 }
 0x5c9   :  { %v497_v53 = vmax.f32 %v493_v49, %v495_v51  ;;  %v496_v54 = vmul.f32 0.2, %v494_v52 }
 0x5cb   :  { %v499_v55 = vsel %vm48_vm3, %v497_v53, -inf  ;;  %v498_v56 = vmax.f32 %v494_v52, %v496_v54 }
 0x5cc   :  { %v501_v57 = vsel %vm239_vm4, %v499_v55, -inf }
 0x5cd   :  { %502 = vmax.xlane.f32.xlu0 %v501_v57  ;;  %v500_v23 = vsel %vm49_vm5, %v498_v56, -inf }
 0x5ce   :  { %v504_v27 = vsel %vm239_vm4, %v500_v23, -inf }
 0x5cf   :  { %505 = vmax.xlane.f32.xlu1 %v504_v27 }
 0x65a   :  { %v503_v58 = vpop.xlane.xlu0 %502 }
 0x65b   :  { %v507_v59 = vsub.f32 %v499_v55, %v503_v58 }
 0x65c   :  { %v506_v60 = vpop.xlane.xlu1 %505 }
 0x65d   :  { %v509_v61 = vmul.f32 1.442695, %v507_v59  ;;  %v508_v62 = vsub.f32 %v500_v23, %v506_v60 }
 0x65f   :  { %926 = vpow2.f32 %v509_v61  ;;  %v511_v63 = vmul.f32 1.442695, %v508_v62 }
 0x661   :  { %928 = vpow2.f32 %v511_v63 }
 0x669   :  { %v927_v0 = vpop.eup %926 }
 0x66a   :  { %v513_v1 = vmul.f32 %v927_v0, %v1036_v34  ;;  %v665_v34 = vld [vmem:[%s1157_s11] sm:$0xff] }
 0x66b   :  { %v929_v2 = vpop.eup %928 }
 0x66c   :  { %v515_v4 = vsel %vm239_vm4, %v513_v1, 0.0  ;;  %v514_v5 = vmul.f32 %v929_v2, %v1038_v38  ;;  %v666_v38 = vld [vmem:[%s1157_s11 + $0x8] sm:$0xff] }
 0x66d   :  { %516 = vadd.xlane.f32.xlu0 %v515_v4  ;;  %v890_v10 = vpack.c.bf16 %v666_v38, %v665_v34 }
 0x66e   :  { %v518_v6 = vsel %vm239_vm4, %v514_v5, 0.0 }
 0x66f   :  { %519 = vadd.xlane.f32.xlu1 %v518_v6  ;;  %891 = vmatprep.subr.bf16.mxu0 %v890_v10 }
 0x6fa   :  { %v517_v11 = vpop.xlane.xlu0 %516 }
 0x6fb   :  { %930 = vrcp.f32 %v517_v11 }
 0x6fc   :  { %v520_v12 = vpop.xlane.xlu1 %519 }
 0x6fd   :  { %932 = vrcp.f32 %v520_v12 }
 0x705   :  { %v931_v13 = vpop.eup %930 }
 0x706   :  { %v523_v15 = vmul.f32 %v931_v13, %v513_v1 }
 0x707   :  { %v933_v14 = vpop.eup %932 }
 0x708   :  { %v524_v16 = vmul.f32 %v933_v14, %v514_v5 }
 0x70a   :  { %v525_v17 = vpack.c.bf16 %v524_v16, %v523_v15 }
 0x70c   :  { %849 = vmatmul.mubr.msk.bf16.vlgmr.msra.gmra.mrb[8].mxu0 %vm239_vm4, %v525_v17 }
 0x70d   :  { %893 = vmatpush3.bf16.msra.mxu0 %v890_v10 }
 0x70e   :  { %895 = vmatprep.subr.bf16.mxu0 %v894_v24 }
 0x711   :  { %897 = vmatpush3.bf16.msra.mxu0 %v894_v24 }
 0x7df   :  { %v569_v26 = vpop.f32.mrb[8].mxu0 }
 0x7e0   :  { %v570_v28 = vadd.f32 %v771_v25, %v569_v26  ;;  %v850_v29 = vpop.f32.mrb[9].mxu0 }
 0x7e1   :  { %v572_v3 = vpop.f32.mrb[10].mxu0 }
 0x7e2   :  { %v576_v30 = vmax.f32 %v570_v28, 0.0  ;;  %v573_v31 = vadd.f32 %v771_v25, %v572_v3  ;;  %v851_v32 = vpop.f32.mrb[11].mxu0 }
 0x7e4   :  { %v577_v33 = vmax.f32 %v573_v31, 0.0  ;;  %860 = vmatprep.mubr.msk.f32.mxu1 %vm144_vm2, %v576_v30  ;;  %871 = vmatprep.mubr.msk.f32.mxu0 %vm144_vm2, %v576_v30 }
 0x7e6   :  { %861 = vmatmul.mubr.msk.f32.vlgmr.msra.gmra.mrb[8].mxu1 %vm144_vm2, %v577_v33  ;;  %872 = vmatmul.mubr.msk.f32.vlgmr.msra.gmra.mrb[12].mxu0 %vm144_vm2, %v577_v33 }
 0x8b9   :  { %v862_v35 = vpop.f32.mrb[8].mxu1  ;;  %v873_v36 = vpop.f32.mrb[12].mxu0 }
 0x8ba   :  { %664 = vst.msk [vmem:[%s1159_s12 + $0x8] sm:$0xff] %vm144_vm2, %v862_v35  ;;  %745 = vst.msk [vmem:[%s1160_s13 + $0x8] sm:$0xff] %vm144_vm2, %v873_v36  ;;  %v654_v37 = vpop.f32.mrb[9].mxu1  ;;  %v735_v39 = vpop.f32.mrb[13].mxu0 }
 0x8bb   :  { %663 = vst.msk [vmem:[%s1159_s12] sm:$0xff] %vm144_vm2, %v654_v37  ;;  %744 = vst.msk [vmem:[%s1160_s13] sm:$0xff] %vm144_vm2, %v735_v39 }

// kernel: edge_prediction_gnn_forward.3
= control target key start
LH: loop header
LB: loop body
LE: loop exit
PB: predicated region body
PF: predicated region fallthrough
CT: control target
= control target key end

     0   :  { %v1209_v0 = vmov 0   ;;  %vm471_vm0 = vcmask 1040384   ;;  %vm422_vm1 = vcmask 7168   ;;  %v35_v58 = vlaneseq  ;;  %s1611_s0 = inlined_call_operand.vmem [shape: s32[128,1], index: 0, kind: input, shape index: {}]   ;;  %s1612_s8 = inlined_call_operand.<no memory space> [shape: f32[1,1], index: 8, kind: input, shape index: {}]   ;;  %s1613_s1 = inlined_call_operand.vmem [shape: s32[128,1], index: 1, kind: input, shape index: {}]   ;;  %s1614_s5 = inlined_call_operand.vmem [shape: f32[1,32], index: 5, kind: input, shape index: {}]   ;;  %s1615_s2 = inlined_call_operand.vmem [shape: f32[128,1], index: 2, kind: input, shape index: {}]   ;;  %s1616_s3 = inlined_call_operand.vmem [shape: f32[16,32], index: 3, kind: input, shape index: {}]   ;;  %s1617_s4 = inlined_call_operand.vmem [shape: f32[16,32], index: 4, kind: input, shape index: {}]   ;;  %s1618_s6 = inlined_call_operand.vmem [shape: f32[1,32], index: 6, kind: input, shape index: {}]   ;;  %s1619_s7 = inlined_call_operand.vmem [shape: f32[1,32], index: 7, kind: input, shape index: {}]   ;;  %s1620_s9 = inlined_call_operand.vmem [shape: f32[1,128], index: 9, kind: output, shape index: {}]  }
   0x1   :  { %1208 = vset.pattern.permute.xlu1 %v1209_v0  ;;  %1207 = vset.pattern.permute.xlu0 %v1209_v0  ;;  %v39_v1 = vld [vmem:[%s1611_s0 + $0x10] sm:$0xff]  ;;  %v37_v2 = vld [vmem:[%s1611_s0] sm:$0xff]  ;;  %v14_v3 = vstv %s1612_s8  ;;  %v40_v4 = vld [vmem:[%s1611_s0 + $0x18] sm:$0xff]  ;;  %vm283_vm6 = vcmask 130048   ;;  %v1210_v0 = vmov 0.0  }
   0x2   :  { %60 = vperm.xlu1 %1208, %v39_v1   ;;  %54 = vperm.xlu0 %1207, %v37_v2   ;;  %15 = vst [vmem:[#allocation2] sm:$0x1] %v14_v3  ;;  %v38_v5 = vld [vmem:[%s1611_s0 + $0x8] sm:$0xff]  ;;  %v157_v7 = vld [vmem:[%s1613_s1] sm:$0xff]  ;;  %v160_v8 = vld [vmem:[%s1613_s1 + $0x18] sm:$0xff]  ;;  %v1444_v59 = vand.u32 127, %v35_v58 }
   0x3   :  { %v158_v6 = vld [vmem:[%s1613_s1 + $0x8] sm:$0xff]  ;;  %v159_v9 = vld [vmem:[%s1613_s1 + $0x10] sm:$0xff]  ;;  %v421_v10 = vld [vmem:[%s1614_s5] sm:$0x1] }
   0x4   :  { %v405_v11 = vld [vmem:[%s1615_s2] sm:$0xff]  ;;  %1092 = vmatprep.subr.msk.mxu1 %vm471_vm0, %v421_v10  ;;  %v406_v12 = vld [vmem:[%s1615_s2 + $0x8] sm:$0xff]  ;;  %v407_v14 = vld [vmem:[%s1615_s2 + $0x10] sm:$0xff] }
   0x5   :  { %1094 = vmatprep.mubr.msk.f32.mxu1 %vm422_vm1, %v405_v11  ;;  %v277_v13 = vld [vmem:[%s1616_s3] sm:$0xff]  ;;  %v278_v15 = vld [vmem:[%s1616_s3 + $0x8] sm:$0xff]  ;;  %1093 = vmatpush3.msk.msra.mxu1 %vm471_vm0, %v421_v10  ;;  %v408_v19 = vld [vmem:[%s1615_s2 + $0x18] sm:$0xff] }
   0x6   :  { %63 = vperm.xlu1 %1208, %v40_v4   ;;  %57 = vperm.xlu0 %1207, %v38_v5   ;;  %v42_v16 = vld [vmem:[%s1611_s0 + $0x28] sm:$0xff]  ;;  %v41_v17 = vld [vmem:[%s1611_s0 + $0x20] sm:$0xff]  ;;  %v279_v18 = vpack.c.bf16 %v278_v15, %v277_v13  ;;  %v44_v23 = vld [vmem:[%s1611_s0 + $0x38] sm:$0xff] }
   0x7   :  { %1095 = vmatmul.mubr.msk.f32.vlgmr.msra.gmra.mrb[0].mxu1 %vm422_vm1, %v406_v12  ;;  %v409_v20 = vld [vmem:[%s1615_s2 + $0x20] sm:$0xff]  ;;  %v281_v22 = vld [vmem:[%s1617_s4 + $0x8] sm:$0xff]  ;;  %v43_v24 = vld [vmem:[%s1611_s0 + $0x30] sm:$0xff] }
   0x8   :  { %1097 = vmatprep.mubr.msk.f32.mxu1 %vm422_vm1, %v407_v14  ;;  %1118 = vmatprep.subr.bf16.mxu1 %v279_v18  ;;  %v280_v21 = vld [vmem:[%s1617_s4] sm:$0xff]  ;;  %v410_v26 = vld [vmem:[%s1615_s2 + $0x28] sm:$0xff]  ;;  %v411_v27 = vld [vmem:[%s1615_s2 + $0x30] sm:$0xff] }
   0x9   :  { %1119 = vmatpush3.bf16.msra.mxu1 %v279_v18  ;;  %v282_v25 = vpack.c.bf16 %v281_v22, %v280_v21  ;;  %v162_v28 = vld [vmem:[%s1613_s1 + $0x28] sm:$0xff]  ;;  %v161_v29 = vld [vmem:[%s1613_s1 + $0x20] sm:$0xff]  ;;  %v412_v30 = vld [vmem:[%s1615_s2 + $0x38] sm:$0xff] }
   0xa   :  { %177 = vperm.xlu1 %1208, %v158_v6   ;;  %174 = vperm.xlu0 %1207, %v157_v7   ;;  %v413_v31 = vld [vmem:[%s1615_s2 + $0x40] sm:$0xff]  ;;  %v164_v32 = vld [vmem:[%s1613_s1 + $0x38] sm:$0xff]  ;;  %v163_v33 = vld [vmem:[%s1613_s1 + $0x30] sm:$0xff] }
   0xb   :  { %1098 = vmatmul.mubr.msk.f32.gmra.mrb[2].mxu1 %vm422_vm1, %v408_v19  ;;  %1074 = vmatprep.subr.bf16.mxu0 %v282_v25  ;;  %v414_v34 = vld [vmem:[%s1615_s2 + $0x48] sm:$0xff]  ;;  %v415_v35 = vld [vmem:[%s1615_s2 + $0x50] sm:$0xff]  ;;  %v45_v37 = vld [vmem:[%s1611_s0 + $0x40] sm:$0xff] }
   0xc   :  { %1100 = vmatprep.mubr.msk.f32.mxu1 %vm422_vm1, %v409_v20  ;;  %1075 = vmatpush3.bf16.msra.mxu0 %v282_v25  ;;  %v46_v36 = vld [vmem:[%s1611_s0 + $0x48] sm:$0xff]  ;;  %v416_v38 = vld [vmem:[%s1615_s2 + $0x58] sm:$0xff]  ;;  %v417_v39 = vld [vmem:[%s1615_s2 + $0x60] sm:$0xff] }
   0xd   :  { %v48_v40 = vld [vmem:[%s1611_s0 + $0x58] sm:$0xff]  ;;  %v47_v41 = vld [vmem:[%s1611_s0 + $0x50] sm:$0xff]  ;;  %v418_v42 = vld [vmem:[%s1615_s2 + $0x68] sm:$0xff] }
   0xe   :  { %183 = vperm.xlu1 %1208, %v160_v8   ;;  %180 = vperm.xlu0 %1207, %v159_v9   ;;  %v419_v43 = vld [vmem:[%s1615_s2 + $0x70] sm:$0xff]  ;;  %v166_v44 = vld [vmem:[%s1613_s1 + $0x48] sm:$0xff]  ;;  %v165_v45 = vld [vmem:[%s1613_s1 + $0x40] sm:$0xff] }
   0xf   :  { %1101 = vmatmul.mubr.msk.f32.gmra.mrb[4].mxu1 %vm422_vm1, %v410_v26  ;;  %v420_v46 = vld [vmem:[%s1615_s2 + $0x78] sm:$0xff]  ;;  %v167_v48 = vld [vmem:[%s1613_s1 + $0x50] sm:$0xff]  ;;  %v50_v49 = vld [vmem:[%s1611_s0 + $0x68] sm:$0xff] }
  0x10   :  { %1103 = vmatprep.mubr.msk.f32.mxu1 %vm422_vm1, %v411_v27  ;;  %v168_v47 = vld [vmem:[%s1613_s1 + $0x58] sm:$0xff]  ;;  %v49_v50 = vld [vmem:[%s1611_s0 + $0x60] sm:$0xff]  ;;  %v51_v52 = vld [vmem:[%s1611_s0 + $0x70] sm:$0xff] }
  0x11   :  { %v52_v51 = vld [vmem:[%s1611_s0 + $0x78] sm:$0xff]  ;;  %v170_v53 = vld [vmem:[%s1613_s1 + $0x68] sm:$0xff]  ;;  %v169_v54 = vld [vmem:[%s1613_s1 + $0x60] sm:$0xff] }
  0x12   :  { %69 = vperm.xlu1 %1208, %v42_v16   ;;  %66 = vperm.xlu0 %1207, %v41_v17   ;;  %v172_v55 = vld [vmem:[%s1613_s1 + $0x78] sm:$0xff]  ;;  %v171_v56 = vld [vmem:[%s1613_s1 + $0x70] sm:$0xff]  ;;  %v797_v57 = vld [vmem:[#allocation2] sm:$0x1] }
  0x13   :  { %1104 = vmatmul.mubr.msk.f32.gmra.mrb[6].mxu1 %vm422_vm1, %v412_v30 }
  0x14   :  { %1106 = vmatprep.mubr.msk.f32.mxu1 %vm422_vm1, %v413_v31 }
  0x16   :  { %75 = vperm.xlu1 %1208, %v44_v23   ;;  %72 = vperm.xlu0 %1207, %v43_v24  }
  0x17   :  { %1107 = vmatmul.mubr.msk.f32.gmra.mrb[8].mxu1 %vm422_vm1, %v414_v34 }
  0x18   :  { %1109 = vmatprep.mubr.msk.f32.mxu1 %vm422_vm1, %v415_v35 }
  0x1a   :  { %189 = vperm.xlu1 %1208, %v162_v28   ;;  %186 = vperm.xlu0 %1207, %v161_v29  }
  0x1b   :  { %1110 = vmatmul.mubr.msk.f32.gmra.mrb[10].mxu1 %vm422_vm1, %v416_v38 }
  0x1c   :  { %1112 = vmatprep.mubr.msk.f32.mxu1 %vm422_vm1, %v417_v39 }
  0x1e   :  { %195 = vperm.xlu1 %1208, %v164_v32   ;;  %192 = vperm.xlu0 %1207, %v163_v33  }
  0x1f   :  { %1113 = vmatmul.mubr.msk.f32.gmra.mrb[12].mxu1 %vm422_vm1, %v418_v42 }
  0x20   :  { %1115 = vmatprep.mubr.msk.f32.mxu1 %vm422_vm1, %v419_v43 }
  0x22   :  { %81 = vperm.xlu1 %1208, %v46_v36   ;;  %78 = vperm.xlu0 %1207, %v45_v37  }
  0x23   :  { %1116 = vmatmul.mubr.msk.f32.gmra.mrb[14].mxu1 %vm422_vm1, %v420_v46 }
  0x26   :  { %87 = vperm.xlu1 %1208, %v48_v40   ;;  %84 = vperm.xlu0 %1207, %v47_v41  }
  0x2a   :  { %201 = vperm.xlu1 %1208, %v166_v44   ;;  %198 = vperm.xlu0 %1207, %v165_v45  }
  0x2e   :  { %207 = vperm.xlu1 %1208, %v168_v47   ;;  %204 = vperm.xlu0 %1207, %v167_v48  }
  0x32   :  { %93 = vperm.xlu1 %1208, %v50_v49   ;;  %90 = vperm.xlu0 %1207, %v49_v50  }
  0x36   :  { %99 = vperm.xlu1 %1208, %v52_v51   ;;  %96 = vperm.xlu0 %1207, %v51_v52  }
  0x3a   :  { %213 = vperm.xlu1 %1208, %v170_v53   ;;  %210 = vperm.xlu0 %1207, %v169_v54  }
  0x3e   :  { %219 = vperm.xlu1 %1208, %v172_v55   ;;  %216 = vperm.xlu0 %1207, %v171_v56  }
  0x42   :  { %800 = vperm.xlu0 %1207, %v797_v57  }
  0x81   :  { %v61_v60 = vpop.permute.xlu1 %60  ;;  %v55_v61 = vpop.permute.xlu0 %54 }
  0x82   :  { %vm103_vm2 = vcmp.eq.s32.totalorder %v1444_v59, %v61_v60  ;;  %vm101_vm3 = vcmp.eq.s32.totalorder %v1444_v59, %v55_v61 }
  0x83   :  { %v941_v1 = vsel %vm103_vm2, 1.0, %v1210_v0  ;;  %v939_v2 = vsel %vm101_vm3, 1.0, %v1210_v0 }
  0x85   :  { %v64_v62 = vpop.permute.xlu1 %63  ;;  %v58_v63 = vpop.permute.xlu0 %57 }
  0x86   :  { %vm104_vm4 = vcmp.eq.s32.totalorder %v1444_v59, %v64_v62  ;;  %vm102_vm5 = vcmp.eq.s32.totalorder %v1444_v59, %v58_v63 }
  0x87   :  { %v942_v3 = vsel %vm104_vm4, 1.0, %v1210_v0  ;;  %v940_v4 = vsel %vm102_vm5, 1.0, %v1210_v0 }
  0x88   :  { %v150_v5 = vpack.c.bf16 %v942_v3, %v941_v1  ;;  %v149_v6 = vpack.c.bf16 %v940_v4, %v939_v2 }
  0x89   :  { %v178_v7 = vpop.permute.xlu1 %177  ;;  %v175_v8 = vpop.permute.xlu0 %174 }
  0x8a   :  { %vm222_vm7 = vcmp.eq.s32.totalorder %v1444_v59, %v178_v7  ;;  %vm221_vm8 = vcmp.eq.s32.totalorder %v1444_v59, %v175_v8  ;;  %1120 = vmatprep.mubr.msk.bf16.mxu1 %vm283_vm6, %v149_v6 }
  0x8b   :  { %v956_v9 = vsel %vm222_vm7, 1.0, %v1210_v0  ;;  %v955_v10 = vsel %vm221_vm8, 1.0, %v1210_v0  ;;  %1121 = vmatmul.mubr.msk.bf16.vlgmr.msra.gmra.mrb[16].mxu1 %vm283_vm6, %v150_v5 }
  0x8c   :  { %v269_v11 = vpack.c.bf16 %v956_v9, %v955_v10 }
  0x8d   :  { %v184_v12 = vpop.permute.xlu1 %183  ;;  %v181_v13 = vpop.permute.xlu0 %180 }
  0x8e   :  { %vm224_vm9 = vcmp.eq.s32.totalorder %v1444_v59, %v184_v12  ;;  %vm223_vm10 = vcmp.eq.s32.totalorder %v1444_v59, %v181_v13  ;;  %1076 = vmatprep.mubr.msk.bf16.mxu0 %vm283_vm6, %v269_v11 }
  0x8f   :  { %v958_v14 = vsel %vm224_vm9, 1.0, %v1210_v0  ;;  %v957_v15 = vsel %vm223_vm10, 1.0, %v1210_v0 }
  0x90   :  { %v270_v16 = vpack.c.bf16 %v958_v14, %v957_v15 }
  0x91   :  { %v70_v17 = vpop.permute.xlu1 %69  ;;  %v67_v18 = vpop.permute.xlu0 %66 }
  0x92   :  { %vm106_vm11 = vcmp.eq.s32.totalorder %v1444_v59, %v70_v17  ;;  %vm105_vm12 = vcmp.eq.s32.totalorder %v1444_v59, %v67_v18  ;;  %1077 = vmatmul.mubr.msk.bf16.vlgmr.msra.gmra.mrb[0].mxu0 %vm283_vm6, %v270_v16 }
  0x93   :  { %v944_v19 = vsel %vm106_vm11, 1.0, %v1210_v0  ;;  %v943_v20 = vsel %vm105_vm12, 1.0, %v1210_v0 }
  0x94   :  { %v151_v21 = vpack.c.bf16 %v944_v19, %v943_v20 }
  0x95   :  { %v76_v22 = vpop.permute.xlu1 %75  ;;  %v73_v23 = vpop.permute.xlu0 %72 }
  0x96   :  { %vm108_vm13 = vcmp.eq.s32.totalorder %v1444_v59, %v76_v22  ;;  %vm107_vm14 = vcmp.eq.s32.totalorder %v1444_v59, %v73_v23  ;;  %1124 = vmatprep.mubr.msk.bf16.mxu1 %vm283_vm6, %v151_v21 }
  0x97   :  { %v946_v24 = vsel %vm108_vm13, 1.0, %v1210_v0  ;;  %v945_v25 = vsel %vm107_vm14, 1.0, %v1210_v0 }
  0x98   :  { %v152_v26 = vpack.c.bf16 %v946_v24, %v945_v25  ;;  %v1211_v24 = vmov 0.0|0.0  }
  0x99   :  { %v190_v27 = vpop.permute.xlu1 %189  ;;  %v187_v28 = vpop.permute.xlu0 %186  ;;  %1171 = vmatprep.subr.bf16.mxu0 %v1211_v24 }
  0x9a   :  { %vm226_vm15 = vcmp.eq.s32.totalorder %v1444_v59, %v190_v27  ;;  %vm225_vm0 = vcmp.eq.s32.totalorder %v1444_v59, %v187_v28  ;;  %1125 = vmatmul.mubr.msk.bf16.gmra.mrb[20].mxu1 %vm283_vm6, %v152_v26 }
  0x9b   :  { %v960_v29 = vsel %vm226_vm15, 1.0, %v1210_v0  ;;  %v959_v30 = vsel %vm225_vm0, 1.0, %v1210_v0 }
  0x9c   :  { %v271_v31 = vpack.c.bf16 %v960_v29, %v959_v30 }
  0x9d   :  { %v196_v32 = vpop.permute.xlu1 %195  ;;  %v193_v33 = vpop.permute.xlu0 %192 }
  0x9e   :  { %vm228_vm1 = vcmp.eq.s32.totalorder %v1444_v59, %v196_v32  ;;  %vm227_vm2 = vcmp.eq.s32.totalorder %v1444_v59, %v193_v33  ;;  %1080 = vmatprep.mubr.msk.bf16.mxu0 %vm283_vm6, %v271_v31 }
  0x9f   :  { %v962_v34 = vsel %vm228_vm1, 1.0, %v1210_v0  ;;  %v961_v35 = vsel %vm227_vm2, 1.0, %v1210_v0 }
  0xa0   :  { %v272_v36 = vpack.c.bf16 %v962_v34, %v961_v35 }
  0xa1   :  { %v82_v37 = vpop.permute.xlu1 %81  ;;  %v79_v38 = vpop.permute.xlu0 %78 }
  0xa2   :  { %vm110_vm3 = vcmp.eq.s32.totalorder %v1444_v59, %v82_v37  ;;  %vm109_vm4 = vcmp.eq.s32.totalorder %v1444_v59, %v79_v38  ;;  %1081 = vmatmul.mubr.msk.bf16.gmra.mrb[4].mxu0 %vm283_vm6, %v272_v36 }
  0xa3   :  { %v948_v39 = vsel %vm110_vm3, 1.0, %v1210_v0  ;;  %v947_v40 = vsel %vm109_vm4, 1.0, %v1210_v0  ;;  %vm807_vm4 = vcmask 261120  }
  0xa4   :  { %v153_v41 = vpack.c.bf16 %v948_v39, %v947_v40 }
  0xa5   :  { %v88_v42 = vpop.permute.xlu1 %87  ;;  %v85_v43 = vpop.permute.xlu0 %84 }
  0xa6   :  { %vm112_vm5 = vcmp.eq.s32.totalorder %v1444_v59, %v88_v42  ;;  %vm111_vm7 = vcmp.eq.s32.totalorder %v1444_v59, %v85_v43  ;;  %1128 = vmatprep.mubr.msk.bf16.mxu1 %vm283_vm6, %v153_v41  ;;  %v1547_v42 = vld [vmem:[%s1618_s6] ss:$0 sm:$0xff] }
  0xa7   :  { %v950_v44 = vsel %vm112_vm5, 1.0, %v1210_v0  ;;  %v949_v45 = vsel %vm111_vm7, 1.0, %v1210_v0  ;;  %vm1555_vm5 = vmpackc.low %vm807_vm4, %vm807_vm4  ;;  %vm932_vm7 = vcmp.lt.s32.totalorder %v1444_v59, 24 }
  0xa8   :  { %v154_v46 = vpack.c.bf16 %v950_v44, %v949_v45 }
  0xa9   :  { %v202_v47 = vpop.permute.xlu1 %201  ;;  %v199_v48 = vpop.permute.xlu0 %198 }
  0xaa   :  { %vm230_vm8 = vcmp.eq.s32.totalorder %v1444_v59, %v202_v47  ;;  %vm229_vm9 = vcmp.eq.s32.totalorder %v1444_v59, %v199_v48  ;;  %1129 = vmatmul.mubr.msk.bf16.gmra.mrb[24].mxu1 %vm283_vm6, %v154_v46 }
  0xab   :  { %v964_v49 = vsel %vm230_vm8, 1.0, %v1210_v0  ;;  %v963_v50 = vsel %vm229_vm9, 1.0, %v1210_v0 }
  0xac   :  { %v273_v51 = vpack.c.bf16 %v964_v49, %v963_v50 }
  0xad   :  { %v208_v52 = vpop.permute.xlu1 %207  ;;  %v205_v53 = vpop.permute.xlu0 %204 }
  0xae   :  { %vm232_vm10 = vcmp.eq.s32.totalorder %v1444_v59, %v208_v52  ;;  %vm231_vm11 = vcmp.eq.s32.totalorder %v1444_v59, %v205_v53  ;;  %1084 = vmatprep.mubr.msk.bf16.mxu0 %vm283_vm6, %v273_v51 }
  0xaf   :  { %v966_v54 = vsel %vm232_vm10, 1.0, %v1210_v0  ;;  %v965_v55 = vsel %vm231_vm11, 1.0, %v1210_v0 }
  0xb0   :  { %v274_v56 = vpack.c.bf16 %v966_v54, %v965_v55 }
  0xb1   :  { %v94_v57 = vpop.permute.xlu1 %93  ;;  %v91_v60 = vpop.permute.xlu0 %90 }
  0xb2   :  { %vm114_vm12 = vcmp.eq.s32.totalorder %v1444_v59, %v94_v57  ;;  %vm113_vm13 = vcmp.eq.s32.totalorder %v1444_v59, %v91_v60  ;;  %1085 = vmatmul.mubr.msk.bf16.gmra.mrb[8].mxu0 %vm283_vm6, %v274_v56 }
  0xb3   :  { %v952_v61 = vsel %vm114_vm12, 1.0, %v1210_v0  ;;  %v951_v62 = vsel %vm113_vm13, 1.0, %v1210_v0 }
  0xb4   :  { %v155_v63 = vpack.c.bf16 %v952_v61, %v951_v62 }
  0xb5   :  { %v100_v1 = vpop.permute.xlu1 %99  ;;  %v97_v2 = vpop.permute.xlu0 %96 }
  0xb6   :  { %vm116_vm14 = vcmp.eq.s32.totalorder %v1444_v59, %v100_v1  ;;  %vm115_vm15 = vcmp.eq.s32.totalorder %v1444_v59, %v97_v2  ;;  %1132 = vmatprep.mubr.msk.bf16.mxu1 %vm283_vm6, %v155_v63 }
  0xb7   :  { %v954_v3 = vsel %vm116_vm14, 1.0, %v1210_v0  ;;  %v953_v4 = vsel %vm115_vm15, 1.0, %v1210_v0 }
  0xb8   :  { %v156_v5 = vpack.c.bf16 %v954_v3, %v953_v4 }
  0xb9   :  { %v214_v6 = vpop.permute.xlu1 %213  ;;  %v211_v7 = vpop.permute.xlu0 %210 }
  0xba   :  { %vm234_vm0 = vcmp.eq.s32.totalorder %v1444_v59, %v214_v6  ;;  %vm233_vm1 = vcmp.eq.s32.totalorder %v1444_v59, %v211_v7  ;;  %1133 = vmatmul.mubr.msk.bf16.gmra.mrb[28].mxu1 %vm283_vm6, %v156_v5 }
  0xbb   :  { %v968_v8 = vsel %vm234_vm0, 1.0, %v1210_v0  ;;  %v967_v9 = vsel %vm233_vm1, 1.0, %v1210_v0 }
  0xbc   :  { %v275_v10 = vpack.c.bf16 %v968_v8, %v967_v9 }
  0xbd   :  { %v220_v11 = vpop.permute.xlu1 %219  ;;  %v217_v12 = vpop.permute.xlu0 %216 }
  0xbe   :  { %vm236_vm2 = vcmp.eq.s32.totalorder %v1444_v59, %v220_v11  ;;  %vm235_vm3 = vcmp.eq.s32.totalorder %v1444_v59, %v217_v12  ;;  %1088 = vmatprep.mubr.msk.bf16.mxu0 %vm283_vm6, %v275_v10 }
  0xbf   :  { %v970_v13 = vsel %vm236_vm2, 1.0, %v1210_v0  ;;  %v969_v14 = vsel %vm235_vm3, 1.0, %v1210_v0 }
  0xc0   :  { %v276_v15 = vpack.c.bf16 %v970_v13, %v969_v14 }
  0xc2   :  { %1089 = vmatmul.mubr.msk.bf16.gmra.mrb[12].mxu0 %vm283_vm6, %v276_v15  ;;  %vm1212_vm6 = vmmov 0  }
  0xc3   :  { %1168 = vmatprep.mubr.msk.f32.mxu0 %vm1212_vm6, %v1210_v0 }
  0xda   :  { %v1096_v16 = vpop.f32.mrb[0].mxu1 }
  0xdb   :  { %v541_v17 = vpop.f32.mrb[1].mxu1 }
  0xde   :  { %v1099_v18 = vpop.f32.mrb[2].mxu1 }
  0xdf   :  { %v551_v19 = vpop.f32.mrb[3].mxu1 }
  0xe2   :  { %v1102_v20 = vpop.f32.mrb[4].mxu1 }
  0xe3   :  { %v561_v21 = vpop.f32.mrb[5].mxu1 }
  0xe6   :  { %v1105_v22 = vpop.f32.mrb[6].mxu1 }
  0xe7   :  { %v571_v23 = vpop.f32.mrb[7].mxu1 }
  0xea   :  { %v1527_v25 = vpop.f32.mrb[8].mxu1 }
  0xeb   :  { %v1529_v26 = vpop.f32.mrb[9].mxu1 }
  0xee   :  { %v1531_v27 = vpop.f32.mrb[10].mxu1 }
  0xef   :  { %v1533_v28 = vpop.f32.mrb[11].mxu1 }
  0xf2   :  { %v1535_v29 = vpop.f32.mrb[12].mxu1 }
  0xf3   :  { %v1537_v30 = vpop.f32.mrb[13].mxu1 }
  0xf6   :  { %v1539_v31 = vpop.f32.mrb[14].mxu1 }
  0xf7   :  { %v1541_v32 = vpop.f32.mrb[15].mxu1 }
 0x15e   :  { %v1122_v33 = vpop.f32.mrb[16].mxu1 }
 0x15f   :  { %v687_v34 = vadd.f32 %v1122_v33, %v551_v19  ;;  %v678_v35 = vpop.f32.mrb[17].mxu1 }
 0x160   :  { %v679_v36 = vadd.f32 %v678_v35, %v541_v17  ;;  %v1123_v37 = vpop.f32.mrb[18].mxu1 }
 0x161   :  { %v690_v38 = vadd.f32 %v1123_v37, %v1099_v18  ;;  %v681_v39 = vpop.f32.mrb[19].mxu1 }
 0x162   :  { %v682_v40 = vadd.f32 %v1096_v16, %v681_v39 }
 0x165   :  { %v1078_v41 = vpop.f32.mrb[0].mxu0 }
 0x166   :  { %v743_v43 = vadd.f32 %v1078_v41, %v687_v34  ;;  %v342_v44 = vpop.f32.mrb[1].mxu0 }
 0x167   :  { %v741_v45 = vadd.f32 %v679_v36, %v342_v44  ;;  %v1079_v46 = vpop.f32.mrb[2].mxu0 }
 0x168   :  { %v766_v0 = vadd.f32 %v1547_v42, %v743_v43  ;;  %v744_v47 = vadd.f32 %v1079_v46, %v690_v38  ;;  %v345_v48 = vpop.f32.mrb[3].mxu0 }
 0x169   :  { %v764_v49 = vadd.f32 %v1547_v42, %v741_v45  ;;  %v742_v50 = vadd.f32 %v682_v40, %v345_v48 }
 0x16a   :  { %v767_v51 = vadd.f32 %v1547_v42, %v744_v47  ;;  %v782_v53 = vmax.f32 %v766_v0, 0.0 }
 0x16b   :  { %v765_v52 = vadd.f32 %v1547_v42, %v742_v50  ;;  %v780_v55 = vmax.f32 %v764_v49, 0.0 }
 0x16c   :  { %v783_v54 = vmax.f32 %v767_v51, 0.0 }
 0x16d   :  { %v781_v56 = vmax.f32 %v765_v52, 0.0  ;;  %v1126_v57 = vpop.f32.mrb[20].mxu1 }
 0x16e   :  { %v1176_v60 = vpack.c.bf16 %v783_v54, %v782_v53  ;;  %v703_v61 = vadd.f32 %v1126_v57, %v571_v23  ;;  %v694_v62 = vpop.f32.mrb[21].mxu1 }
 0x16f   :  { %v1172_v1 = vpack.c.bf16 %v781_v56, %v780_v55  ;;  %v695_v2 = vadd.f32 %v694_v62, %v561_v21  ;;  %v1127_v3 = vpop.f32.mrb[22].mxu1 }
 0x170   :  { %v706_v4 = vadd.f32 %v1127_v3, %v1105_v22  ;;  %v697_v5 = vpop.f32.mrb[23].mxu1 }
 0x171   :  { %v698_v6 = vadd.f32 %v1102_v20, %v697_v5  ;;  %1174 = vmatpush3.bf16.xpose.msk.msra.mxu0 %vm1555_vm5, %v1172_v1 }
 0x172   :  { %1175 = vmatprep.subr.bf16.mxu0 %v1211_v24 }
 0x175   :  { %v1082_v7 = vpop.f32.mrb[4].mxu0 }
 0x176   :  { %v747_v8 = vadd.f32 %v1082_v7, %v703_v61  ;;  %v358_v9 = vpop.f32.mrb[5].mxu0 }
 0x177   :  { %v745_v10 = vadd.f32 %v695_v2, %v358_v9  ;;  %v1083_v11 = vpop.f32.mrb[6].mxu0 }
 0x178   :  { %v770_v12 = vadd.f32 %v1547_v42, %v747_v8  ;;  %v748_v13 = vadd.f32 %v1083_v11, %v706_v4  ;;  %v361_v14 = vpop.f32.mrb[7].mxu0 }
 0x179   :  { %v768_v15 = vadd.f32 %v1547_v42, %v745_v10  ;;  %v746_v16 = vadd.f32 %v698_v6, %v361_v14  ;;  %1178 = vmatpush3.bf16.xpose.msk.msra.mxu0 %vm1555_vm5, %v1176_v60 }
 0x17a   :  { %v771_v17 = vadd.f32 %v1547_v42, %v748_v13  ;;  %1179 = vmatprep.subr.bf16.mxu0 %v1211_v24  ;;  %v786_v19 = vmax.f32 %v770_v12, 0.0 }
 0x17b   :  { %v769_v18 = vadd.f32 %v1547_v42, %v746_v16  ;;  %v784_v21 = vmax.f32 %v768_v15, 0.0 }
 0x17c   :  { %v787_v20 = vmax.f32 %v771_v17, 0.0 }
 0x17d   :  { %v785_v22 = vmax.f32 %v769_v18, 0.0  ;;  %v1130_v23 = vpop.f32.mrb[24].mxu1  ;;  %v796_v18 = vld [vmem:[%s1619_s7] sm:$0x1] }
 0x17e   :  { %v1184_v33 = vpack.c.bf16 %v787_v20, %v786_v19  ;;  %v719_v34 = vadd.f32 %v1130_v23, %v1533_v28  ;;  %v710_v35 = vpop.f32.mrb[25].mxu1  ;;  %v801_v20 = vpop.permute.xlu0 %800 }
 0x17f   :  { %v1180_v36 = vpack.c.bf16 %v785_v22, %v784_v21  ;;  %v711_v37 = vadd.f32 %v710_v35, %v1529_v26  ;;  %v1131_v38 = vpop.f32.mrb[26].mxu1 }
 0x180   :  { %v722_v39 = vadd.f32 %v1131_v38, %v1531_v27  ;;  %v713_v40 = vpop.f32.mrb[27].mxu1 }
 0x181   :  { %v714_v41 = vadd.f32 %v1527_v25, %v713_v40  ;;  %1182 = vmatpush3.bf16.xpose.msk.msra.mxu0 %vm1555_vm5, %v1180_v36 }
 0x182   :  { %1183 = vmatprep.subr.bf16.mxu0 %v1211_v24 }
 0x185   :  { %v1086_v43 = vpop.f32.mrb[8].mxu0 }
 0x186   :  { %v751_v44 = vadd.f32 %v1086_v43, %v719_v34  ;;  %v374_v45 = vpop.f32.mrb[9].mxu0 }
 0x187   :  { %v749_v46 = vadd.f32 %v711_v37, %v374_v45  ;;  %v1087_v28 = vpop.f32.mrb[10].mxu0 }
 0x188   :  { %v774_v0 = vadd.f32 %v1547_v42, %v751_v44  ;;  %v752_v47 = vadd.f32 %v1087_v28, %v722_v39  ;;  %v377_v26 = vpop.f32.mrb[11].mxu0 }
 0x189   :  { %v772_v48 = vadd.f32 %v1547_v42, %v749_v46  ;;  %v750_v27 = vadd.f32 %v714_v41, %v377_v26  ;;  %1186 = vmatpush3.bf16.xpose.msk.msra.mxu0 %vm1555_vm5, %v1184_v33 }
 0x18a   :  { %v775_v25 = vadd.f32 %v1547_v42, %v752_v47  ;;  %1187 = vmatprep.subr.bf16.mxu0 %v1211_v24  ;;  %v790_v50 = vmax.f32 %v774_v0, 0.0 }
 0x18b   :  { %v773_v49 = vadd.f32 %v1547_v42, %v750_v27  ;;  %v788_v52 = vmax.f32 %v772_v48, 0.0 }
 0x18c   :  { %v791_v51 = vmax.f32 %v775_v25, 0.0 }
 0x18d   :  { %v789_v53 = vmax.f32 %v773_v49, 0.0  ;;  %v1134_v54 = vpop.f32.mrb[28].mxu1 }
 0x18e   :  { %v1192_v55 = vpack.c.bf16 %v791_v51, %v790_v50  ;;  %v735_v56 = vadd.f32 %v1134_v54, %v1541_v32  ;;  %v726_v57 = vpop.f32.mrb[29].mxu1 }
 0x18f   :  { %v1188_v60 = vpack.c.bf16 %v789_v53, %v788_v52  ;;  %v727_v61 = vadd.f32 %v726_v57, %v1537_v30  ;;  %v1135_v62 = vpop.f32.mrb[30].mxu1 }
 0x190   :  { %v738_v1 = vadd.f32 %v1135_v62, %v1539_v31  ;;  %v729_v2 = vpop.f32.mrb[31].mxu1 }
 0x191   :  { %v730_v3 = vadd.f32 %v1535_v29, %v729_v2  ;;  %1190 = vmatpush3.bf16.xpose.msk.msra.mxu0 %vm1555_vm5, %v1188_v60 }
 0x192   :  { %1191 = vmatprep.subr.bf16.mxu0 %v1211_v24 }
 0x195   :  { %v1090_v4 = vpop.f32.mrb[12].mxu0 }
 0x196   :  { %v755_v5 = vadd.f32 %v1090_v4, %v735_v56  ;;  %v390_v6 = vpop.f32.mrb[13].mxu0 }
 0x197   :  { %v753_v7 = vadd.f32 %v727_v61, %v390_v6  ;;  %v1091_v32 = vpop.f32.mrb[14].mxu0 }
 0x198   :  { %v778_v8 = vadd.f32 %v1547_v42, %v755_v5  ;;  %v756_v9 = vadd.f32 %v1091_v32, %v738_v1  ;;  %v393_v30 = vpop.f32.mrb[15].mxu0 }
 0x199   :  { %v776_v10 = vadd.f32 %v1547_v42, %v753_v7  ;;  %v754_v31 = vadd.f32 %v730_v3, %v393_v30  ;;  %1194 = vmatpush3.bf16.xpose.msk.msra.mxu0 %vm1555_vm5, %v1192_v55 }
 0x19a   :  { %v779_v29 = vadd.f32 %v1547_v42, %v756_v9  ;;  %1195 = vmatprep.subr.bf16.mxu0 %v1211_v24  ;;  %v794_v12 = vmax.f32 %v778_v8, 0.0 }
 0x19b   :  { %v777_v11 = vadd.f32 %v1547_v42, %v754_v31  ;;  %v792_v14 = vmax.f32 %v776_v10, 0.0  ;;  %v804_v42 = vshrl.u32 %v35_v58, 7 }
 0x19c   :  { %v795_v13 = vmax.f32 %v779_v29, 0.0 }
 0x19d   :  { %v793_v15 = vmax.f32 %v777_v11, 0.0  ;;  %v805_v19 = vsub.s32 0, %v804_v42 }
 0x19e   :  { %v1200_v16 = vpack.c.bf16 %v795_v13, %v794_v12 }
 0x19f   :  { %v1196_v17 = vpack.c.bf16 %v793_v15, %v792_v14  ;;  %v806_v21 = vrot.slane %v801_v20, %v805_v19 }
 0x1a1   :  { %1198 = vmatpush3.bf16.xpose.msk.msra.mxu0 %vm1555_vm5, %v1196_v17 }
 0x1a2   :  { %1199 = vmatprep.subr.bf16.mxu0 %v1211_v24 }
 0x1a9   :  { %1202 = vmatpush3.bf16.xpose.msk.msra.mxu0 %vm1555_vm5, %v1200_v16 }
 0x1b0   :  { %1169 = vmatmul.mubr.msk.f32.vlgmr.msra.gmra.mrb[16].mxu0 %vm807_vm4, %v796_v18 }
 0x283   :  { %v925_v22 = vpop.f32.mrb[16].mxu0 }
 0x284   :  { %v926_v23 = vadd.f32 %v925_v22, %v806_v21  ;;  %v1170_v33 = vpop.f32.mrb[17].mxu0 }
 0x286   :  { %v933_v24 = vsel %vm932_vm7, %v926_v23, 0.0 }
 0x287   :  { %934 = vst [vmem:[%s1620_s9] sm:$0x1] %v933_v24 }

</bundles_post_ra>
